<compile_context>
chip_gen: v5e
topology: v5e:2x2
jax: 0.10.0
libtpu: 0.0.40
codegen_flags: <defaults>
</compile_context>

<pallas_src>
import math

import jax
import jax.numpy as jnp
from jax.experimental import pallas as pl
from jax.experimental.pallas import tpu as pltpu

WINDOW_SIZE = 11
SIGMA = 1.5
C1 = 0.01 ** 2
C2 = 0.03 ** 2
_MIB = 1024 * 1024


def _gaussian_1d(window_size: int, sigma: float) -> jnp.ndarray:
    center = window_size // 2
    g = jnp.asarray(
        [math.exp(-((x - center) ** 2) / float(2 * sigma ** 2)) for x in range(window_size)],
        dtype=jnp.float32,
    )
    return g / jnp.sum(g)


def _banded_conv_matrix(n: int, g: jnp.ndarray, window_size: int) -> jnp.ndarray:
    """K[i, j] = g[j - i + pad] inside the band else 0.  X @ K == same-padded 1D conv.

    The Gaussian is symmetric, so K is symmetric and applies identically on
    either side of the operand.
    """
    pad = window_size // 2
    idx = jnp.arange(n)
    d = idx[None, :] - idx[:, None] + pad            # (n, n)
    valid = (d >= 0) & (d < window_size)
    vals = g[jnp.clip(d, 0, window_size - 1)]
    return jnp.where(valid, vals, 0.0).astype(jnp.float32)


def _ssim_kernel(x1_ref, x2_ref, kw_ref, kh_ref, o_ref):
    bp, H, W = x1_ref.shape                          # block of bp planes
    x1 = x1_ref[...].astype(jnp.float32)             # (bp, H, W)
    x2 = x2_ref[...].astype(jnp.float32)
    kw = kw_ref[...]                                 # (W, W), symmetric band
    kh = kh_ref[...]                                 # (H, H), symmetric band

    def gauss2d(op):
        # Separable "same"-padded Gaussian conv as two fat weight-resident matmuls.
        # W-pass: M = bp*H rows, kw stays resident.
        t = jnp.dot(op.reshape(bp * H, W), kw, preferred_element_type=jnp.float32)
        # Per-plane transpose (XLU, overlaps MXU), then H-pass: M = bp*W rows.
        tt = jnp.swapaxes(t.reshape(bp, H, W), 1, 2)                       # (bp, W, H)
        c = jnp.dot(tt.reshape(bp * W, H), kh, preferred_element_type=jnp.float32)
        return c.reshape(bp, W, H)                   # keep (plane, W, H); never transpose back

    mu1 = gauss2d(x1)
    mu2 = gauss2d(x2)
    e11 = gauss2d(x1 * x1)
    e22 = gauss2d(x2 * x2)
    e12 = gauss2d(x1 * x2)

    mu1_sq = mu1 * mu1
    mu2_sq = mu2 * mu2
    mu1_mu2 = mu1 * mu2
    num = (2.0 * mu1_mu2 + C1) * (2.0 * (e12 - mu1_mu2) + C2)
    den = (mu1_sq + mu2_sq + C1) * ((e11 - mu1_sq) + (e22 - mu2_sq) + C2)
    # Exact divide on purpose: pl.reciprocal(approx=True) can cost ~1e-4..1e-3
    # relative error, too close to the 1e-4 validation tolerance.
    ssim_map = num / den                                                   # (bp, W, H)

    # Per-plane means: lane-axis reduce (H) then sublane-axis reduce (W); stored
    # as one lane-dense (1, 1, bp) row per grid step (no per-plane scalar stores,
    # no selector matmul).
    sums = jnp.sum(jnp.sum(ssim_map, axis=2), axis=1, keepdims=True)       # (bp, 1)
    o_ref[...] = sums.reshape(1, 1, bp) * (1.0 / (H * W))


def _vmem_budget_bytes() -> int:
    """Generation-aware VMEM budget: ~3/4 of physical VMEM, clamped to [32, 96] MiB.
    v5e/v6e (128 MiB) -> 96 MiB; v7x (64 MiB per TC) -> 48 MiB."""
    try:
        cap = int(pltpu.get_tpu_info().vmem_capacity_bytes)
    except Exception:
        cap = 64 * _MIB                              # conservative fallback (v7x per-TC size)
    return int(max(32 * _MIB, min(cap * 3 // 4, 96 * _MIB)))


def _choose_bp(nc: int, h: int, w: int, vmem_budget: int) -> int:
    """Planes per grid step: big enough to amortize grid overhead and fatten
    M = Bp*H / Bp*W on the MXU, small enough that the working set (double-buffered
    inputs + 5 conv results + matmul/elementwise temps) fits the generation-aware
    VMEM budget, and >= 2 grid steps so both v7x TensorCores get work."""
    per_plane_bytes = 80 * h * w                     # f32: 2 inputs x 2 bufs + results + temps
    avail = max(per_plane_bytes, int(0.8 * vmem_budget) - 4 * (h * h + w * w))
    bp = max(1, min(nc, avail // per_plane_bytes, 512))
    if nc > 1 and pl.cdiv(nc, bp) < 2:
        bp = pl.cdiv(nc, 2)
    return int(bp)


def _make_call(num_steps, Bp, H, W, vmem_limit, cost, single_buffer_consts):
    const_kw = {}
    if single_buffer_consts:
        # Constant operands (index_map == (0, 0) every step): no point double-buffering.
        const_kw = dict(pipeline_mode=pl.Buffered(1))
    return pl.pallas_call(
        _ssim_kernel,
        out_shape=jax.ShapeDtypeStruct((num_steps, 1, Bp), jnp.float32),
        grid_spec=pltpu.PrefetchScalarGridSpec(
            num_scalar_prefetch=0,
            grid=(num_steps,),
            in_specs=[
                pl.BlockSpec((Bp, H, W), lambda i: (i, 0, 0)),
                pl.BlockSpec((Bp, H, W), lambda i: (i, 0, 0)),
                pl.BlockSpec((W, W), lambda i: (0, 0), **const_kw),
                pl.BlockSpec((H, H), lambda i: (0, 0), **const_kw),
            ],
            out_specs=pl.BlockSpec((1, 1, Bp), lambda i: (i, 0, 0)),
        ),
        compiler_params=pltpu.CompilerParams(
            dimension_semantics=("parallel",),
            vmem_limit_bytes=vmem_limit,
        ),
        cost_estimate=cost,
    )


def ssim_pallas(img1: jnp.ndarray, img2: jnp.ndarray,
                window_size: int = WINDOW_SIZE, size_average: bool = True) -> jnp.ndarray:
    assert img1.shape == img2.shape
    N, Cc, H, W = img1.shape
    NC = N * Cc
    x1 = img1.reshape(NC, H, W).astype(jnp.float32)
    x2 = img2.reshape(NC, H, W).astype(jnp.float32)

    vmem_limit = _vmem_budget_bytes()
    Bp = _choose_bp(NC, H, W, vmem_limit)
    num_steps = pl.cdiv(NC, Bp)
    NC_pad = num_steps * Bp
    if NC_pad != NC:
        pad = NC_pad - NC
        zeros = jnp.zeros((pad, H, W), jnp.float32)
        x1 = jnp.concatenate([x1, zeros], axis=0)
        x2 = jnp.concatenate([x2, zeros], axis=0)

    g = _gaussian_1d(window_size, SIGMA)
    kh = _banded_conv_matrix(H, g, window_size)              # (H, H), symmetric
    kw = _banded_conv_matrix(W, g, window_size)              # (W, W), symmetric

    flops = int(NC_pad * (5 * 2 * H * W * (H + W) + 30 * H * W))
    bytes_accessed = int(4 * (2 * NC_pad * H * W + H * H + W * W + NC_pad))
    cost = pl.CostEstimate(flops=flops, transcendentals=0, bytes_accessed=bytes_accessed)

    try:
        per_plane = _make_call(num_steps, Bp, H, W, vmem_limit, cost, True)(x1, x2, kw, kh)
    except Exception:
        # pl.Buffered(1) on the constant weights is a VMEM-only optimization; fall
        # back to default double-buffering if this JAX/Mosaic build rejects it.
        per_plane = _make_call(num_steps, Bp, H, W, vmem_limit, cost, False)(x1, x2, kw, kh)

    per_plane = per_plane.reshape(NC_pad)[:NC].reshape(N, Cc)
    if size_average:
        # every plane has H*W elements -> mean of per-plane means == global mean
        return jnp.mean(per_plane)
    else:
        # matches ssim_map.mean(1).mean(1).mean(1): per-batch mean over (C, H, W)
        return jnp.mean(per_plane, axis=1)


def _ssim_reference(img1, img2, window_size=WINDOW_SIZE, size_average=True):
    """Pure-JAX reference using lax.conv (depthwise, same padding) for validation."""
    N, Cc, H, W = img1.shape
    g = _gaussian_1d(window_size, SIGMA)
    w2d = jnp.outer(g, g)
    window = jnp.broadcast_to(w2d, (Cc, 1, window_size, window_size)).astype(jnp.float32)
    pad = window_size // 2

    def conv(x):
        return jax.lax.conv_general_dilated(
            x, window, window_strides=(1, 1), padding=[(pad, pad), (pad, pad)],
            dimension_numbers=("NCHW", "OIHW", "NCHW"), feature_group_count=Cc)

    mu1, mu2 = conv(img1), conv(img2)
    mu1_sq, mu2_sq, mu1_mu2 = mu1 * mu1, mu2 * mu2, mu1 * mu2
    s1 = conv(img1 * img1) - mu1_sq
    s2 = conv(img2 * img2) - mu2_sq
    s12 = conv(img1 * img2) - mu1_mu2
    ssim_map = (2 * mu1_mu2 + C1) * (2 * s12 + C2) / ((mu1_sq + mu2_sq + C1) * (s1 + s2 + C2))
    return jnp.mean(ssim_map) if size_average else jnp.mean(ssim_map, axis=(1, 2, 3))


if __name__ == "__main__":
    key = jax.random.PRNGKey(0)
    k1, k2 = jax.random.split(key)
    N, Cc, H, W = 2, 4, 16, 16
    img1 = jax.random.uniform(k1, (N, Cc, H, W), dtype=jnp.float32)
    img2 = jax.random.uniform(k2, (N, Cc, H, W), dtype=jnp.float32)

    out = ssim_pallas(img1, img2)
    out = jax.block_until_ready(out)

    ref = jax.block_until_ready(_ssim_reference(img1, img2))
    assert jnp.allclose(out, ref, rtol=1e-4, atol=1e-4), (out, ref)

    print("KERNEL_OK")
</pallas_src>

<mosaic_0001>
module attributes {stable_mosaic.version = 11 : i64} {
  func.func @_ssim_kernel(%arg0: i32, %arg1: memref<4x16x16xf32, #tpu.memory_space<vmem>>, %arg2: memref<4x16x16xf32, #tpu.memory_space<vmem>>, %arg3: memref<16x16xf32, #tpu.memory_space<vmem>>, %arg4: memref<16x16xf32, #tpu.memory_space<vmem>>, %arg5: memref<1x1x4xf32, #tpu.memory_space<vmem>>) attributes {dimension_semantics = [#tpu.dimension_semantics<parallel>], iteration_bounds = array<i64: 2>, scalar_prefetch = 0 : i64, scratch_operands = 0 : i64, tpu.core_type = #tpu.core_type<tc>, window_params = [{transform_indices = @transform_0, window_bounds = array<i64: 4, 16, 16>}, {transform_indices = @transform_1, window_bounds = array<i64: 4, 16, 16>}, {pipeline_mode = #tpu.pipeline_mode<synchronous>, transform_indices = @transform_2, window_bounds = array<i64: 16, 16>}, {pipeline_mode = #tpu.pipeline_mode<synchronous>, transform_indices = @transform_3, window_bounds = array<i64: 16, 16>}, {transform_indices = @transform_4, window_bounds = array<i64: 1, 1, 4>}]} {
    %c0 = arith.constant 0 : index
    %c0_0 = arith.constant 0 : index
    %c0_1 = arith.constant 0 : index
    %0 = vector.load %arg1[%c0, %c0_0, %c0_1] : memref<4x16x16xf32, #tpu.memory_space<vmem>>, vector<4x16x16xf32>
    %c0_2 = arith.constant 0 : index
    %c0_3 = arith.constant 0 : index
    %c0_4 = arith.constant 0 : index
    %1 = vector.load %arg2[%c0_2, %c0_3, %c0_4] : memref<4x16x16xf32, #tpu.memory_space<vmem>>, vector<4x16x16xf32>
    %c0_5 = arith.constant 0 : index
    %c0_6 = arith.constant 0 : index
    %2 = vector.load %arg3[%c0_5, %c0_6] : memref<16x16xf32, #tpu.memory_space<vmem>>, vector<16x16xf32>
    %c0_7 = arith.constant 0 : index
    %c0_8 = arith.constant 0 : index
    %3 = vector.load %arg4[%c0_7, %c0_8] : memref<16x16xf32, #tpu.memory_space<vmem>>, vector<16x16xf32>
    %4 = vector.shape_cast %0 : vector<4x16x16xf32> to vector<64x16xf32>
    %cst = arith.constant dense<0.000000e+00> : vector<64x16xf32>
    %5 = tpu.matmul %4, %2, %cst {dimension_numbers = #tpu.dot_dimension_numbers<[1], [0], [0], [1], [0, 0, 1, 1], [], []>} : vector<64x16xf32>, vector<16x16xf32>, vector<64x16xf32> -> vector<64x16xf32>
    %6 = vector.shape_cast %5 : vector<64x16xf32> to vector<4x16x16xf32>
    %7 = tpu.transpose %6, [0, 2, 1] : vector<4x16x16xf32> -> vector<4x16x16xf32>
    %8 = vector.shape_cast %7 : vector<4x16x16xf32> to vector<64x16xf32>
    %cst_9 = arith.constant dense<0.000000e+00> : vector<64x16xf32>
    %9 = tpu.matmul %8, %3, %cst_9 {dimension_numbers = #tpu.dot_dimension_numbers<[1], [0], [0], [1], [0, 0, 1, 1], [], []>} : vector<64x16xf32>, vector<16x16xf32>, vector<64x16xf32> -> vector<64x16xf32>
    %10 = vector.shape_cast %9 : vector<64x16xf32> to vector<4x16x16xf32>
    %11 = vector.shape_cast %1 : vector<4x16x16xf32> to vector<64x16xf32>
    %cst_10 = arith.constant dense<0.000000e+00> : vector<64x16xf32>
    %12 = tpu.matmul %11, %2, %cst_10 {dimension_numbers = #tpu.dot_dimension_numbers<[1], [0], [0], [1], [0, 0, 1, 1], [], []>} : vector<64x16xf32>, vector<16x16xf32>, vector<64x16xf32> -> vector<64x16xf32>
    %13 = vector.shape_cast %12 : vector<64x16xf32> to vector<4x16x16xf32>
    %14 = tpu.transpose %13, [0, 2, 1] : vector<4x16x16xf32> -> vector<4x16x16xf32>
    %15 = vector.shape_cast %14 : vector<4x16x16xf32> to vector<64x16xf32>
    %cst_11 = arith.constant dense<0.000000e+00> : vector<64x16xf32>
    %16 = tpu.matmul %15, %3, %cst_11 {dimension_numbers = #tpu.dot_dimension_numbers<[1], [0], [0], [1], [0, 0, 1, 1], [], []>} : vector<64x16xf32>, vector<16x16xf32>, vector<64x16xf32> -> vector<64x16xf32>
    %17 = vector.shape_cast %16 : vector<64x16xf32> to vector<4x16x16xf32>
    %18 = arith.mulf %0, %0 : vector<4x16x16xf32>
    %19 = vector.shape_cast %18 : vector<4x16x16xf32> to vector<64x16xf32>
    %cst_12 = arith.constant dense<0.000000e+00> : vector<64x16xf32>
    %20 = tpu.matmul %19, %2, %cst_12 {dimension_numbers = #tpu.dot_dimension_numbers<[1], [0], [0], [1], [0, 0, 1, 1], [], []>} : vector<64x16xf32>, vector<16x16xf32>, vector<64x16xf32> -> vector<64x16xf32>
    %21 = vector.shape_cast %20 : vector<64x16xf32> to vector<4x16x16xf32>
    %22 = tpu.transpose %21, [0, 2, 1] : vector<4x16x16xf32> -> vector<4x16x16xf32>
    %23 = vector.shape_cast %22 : vector<4x16x16xf32> to vector<64x16xf32>
    %cst_13 = arith.constant dense<0.000000e+00> : vector<64x16xf32>
    %24 = tpu.matmul %23, %3, %cst_13 {dimension_numbers = #tpu.dot_dimension_numbers<[1], [0], [0], [1], [0, 0, 1, 1], [], []>} : vector<64x16xf32>, vector<16x16xf32>, vector<64x16xf32> -> vector<64x16xf32>
    %25 = vector.shape_cast %24 : vector<64x16xf32> to vector<4x16x16xf32>
    %26 = arith.mulf %1, %1 : vector<4x16x16xf32>
    %27 = vector.shape_cast %26 : vector<4x16x16xf32> to vector<64x16xf32>
    %cst_14 = arith.constant dense<0.000000e+00> : vector<64x16xf32>
    %28 = tpu.matmul %27, %2, %cst_14 {dimension_numbers = #tpu.dot_dimension_numbers<[1], [0], [0], [1], [0, 0, 1, 1], [], []>} : vector<64x16xf32>, vector<16x16xf32>, vector<64x16xf32> -> vector<64x16xf32>
    %29 = vector.shape_cast %28 : vector<64x16xf32> to vector<4x16x16xf32>
    %30 = tpu.transpose %29, [0, 2, 1] : vector<4x16x16xf32> -> vector<4x16x16xf32>
    %31 = vector.shape_cast %30 : vector<4x16x16xf32> to vector<64x16xf32>
    %cst_15 = arith.constant dense<0.000000e+00> : vector<64x16xf32>
    %32 = tpu.matmul %31, %3, %cst_15 {dimension_numbers = #tpu.dot_dimension_numbers<[1], [0], [0], [1], [0, 0, 1, 1], [], []>} : vector<64x16xf32>, vector<16x16xf32>, vector<64x16xf32> -> vector<64x16xf32>
    %33 = vector.shape_cast %32 : vector<64x16xf32> to vector<4x16x16xf32>
    %34 = arith.mulf %0, %1 : vector<4x16x16xf32>
    %35 = vector.shape_cast %34 : vector<4x16x16xf32> to vector<64x16xf32>
    %cst_16 = arith.constant dense<0.000000e+00> : vector<64x16xf32>
    %36 = tpu.matmul %35, %2, %cst_16 {dimension_numbers = #tpu.dot_dimension_numbers<[1], [0], [0], [1], [0, 0, 1, 1], [], []>} : vector<64x16xf32>, vector<16x16xf32>, vector<64x16xf32> -> vector<64x16xf32>
    %37 = vector.shape_cast %36 : vector<64x16xf32> to vector<4x16x16xf32>
    %38 = tpu.transpose %37, [0, 2, 1] : vector<4x16x16xf32> -> vector<4x16x16xf32>
    %39 = vector.shape_cast %38 : vector<4x16x16xf32> to vector<64x16xf32>
    %cst_17 = arith.constant dense<0.000000e+00> : vector<64x16xf32>
    %40 = tpu.matmul %39, %3, %cst_17 {dimension_numbers = #tpu.dot_dimension_numbers<[1], [0], [0], [1], [0, 0, 1, 1], [], []>} : vector<64x16xf32>, vector<16x16xf32>, vector<64x16xf32> -> vector<64x16xf32>
    %41 = vector.shape_cast %40 : vector<64x16xf32> to vector<4x16x16xf32>
    %42 = arith.mulf %10, %10 : vector<4x16x16xf32>
    %43 = arith.mulf %17, %17 : vector<4x16x16xf32>
    %44 = arith.mulf %10, %17 : vector<4x16x16xf32>
    %cst_18 = arith.constant 2.000000e+00 : f32
    %45 = vector.broadcast %cst_18 : f32 to vector<4x16x16xf32>
    %46 = arith.mulf %45, %44 : vector<4x16x16xf32>
    %cst_19 = arith.constant 9.99999974E-5 : f32
    %47 = vector.broadcast %cst_19 : f32 to vector<4x16x16xf32>
    %48 = arith.addf %46, %47 : vector<4x16x16xf32>
    %49 = arith.subf %41, %44 : vector<4x16x16xf32>
    %cst_20 = arith.constant 2.000000e+00 : f32
    %50 = vector.broadcast %cst_20 : f32 to vector<4x16x16xf32>
    %51 = arith.mulf %50, %49 : vector<4x16x16xf32>
    %cst_21 = arith.constant 8.99999984E-4 : f32
    %52 = vector.broadcast %cst_21 : f32 to vector<4x16x16xf32>
    %53 = arith.addf %51, %52 : vector<4x16x16xf32>
    %54 = arith.mulf %48, %53 : vector<4x16x16xf32>
    %55 = arith.addf %42, %43 : vector<4x16x16xf32>
    %cst_22 = arith.constant 9.99999974E-5 : f32
    %56 = vector.broadcast %cst_22 : f32 to vector<4x16x16xf32>
    %57 = arith.addf %55, %56 : vector<4x16x16xf32>
    %58 = arith.subf %25, %42 : vector<4x16x16xf32>
    %59 = arith.subf %33, %43 : vector<4x16x16xf32>
    %60 = arith.addf %58, %59 : vector<4x16x16xf32>
    %cst_23 = arith.constant 8.99999984E-4 : f32
    %61 = vector.broadcast %cst_23 : f32 to vector<4x16x16xf32>
    %62 = arith.addf %60, %61 : vector<4x16x16xf32>
    %63 = arith.mulf %57, %62 : vector<4x16x16xf32>
    %64 = arith.divf %54, %63 : vector<4x16x16xf32>
    %cst_24 = arith.constant dense<0.000000e+00> : vector<4x16xf32>
    %65 = vector.multi_reduction <add>, %64, %cst_24 [2] : vector<4x16x16xf32> to vector<4x16xf32>
    %cst_25 = arith.constant dense<0.000000e+00> : vector<4xf32>
    %66 = vector.multi_reduction <add>, %65, %cst_25 [1] : vector<4x16xf32> to vector<4xf32>
    %67 = vector.shape_cast %66 : vector<4xf32> to vector<4x1xf32>
    %68 = vector.shape_cast %67 : vector<4x1xf32> to vector<1x1x4xf32>
    %cst_26 = arith.constant 3.906250e-03 : f32
    %69 = vector.broadcast %cst_26 : f32 to vector<1x1x4xf32>
    %70 = arith.mulf %68, %69 : vector<1x1x4xf32>
    %c0_27 = arith.constant 0 : index
    %c0_28 = arith.constant 0 : index
    %c0_29 = arith.constant 0 : index
    %71 = vector.load %arg5[%c0_27, %c0_28, %c0_29] : memref<1x1x4xf32, #tpu.memory_space<vmem>>, vector<1x1x4xf32>
    tpu.vector_store %arg5[%c0_27, %c0_28, %c0_29], %70 {strides = array<i32>} : memref<1x1x4xf32, #tpu.memory_space<vmem>>, vector<1x1x4xf32>,
    return
  }
  func.func @transform_0(%arg0: i32) -> (i32, i32, i32) {
    %c0_i32 = arith.constant 0 : i32
    %c0_i32_0 = arith.constant 0 : i32
    %c0_i32_1 = arith.constant 0 : i32
    return %arg0, %c0_i32, %c0_i32_0 : i32, i32, i32
  }
  func.func @transform_1(%arg0: i32) -> (i32, i32, i32) {
    %c0_i32 = arith.constant 0 : i32
    %c0_i32_0 = arith.constant 0 : i32
    %c0_i32_1 = arith.constant 0 : i32
    return %arg0, %c0_i32, %c0_i32_0 : i32, i32, i32
  }
  func.func @transform_2(%arg0: i32) -> (i32, i32) {
    %c0_i32 = arith.constant 0 : i32
    %c0_i32_0 = arith.constant 0 : i32
    %c0_i32_1 = arith.constant 0 : i32
    return %c0_i32, %c0_i32_0 : i32, i32
  }
  func.func @transform_3(%arg0: i32) -> (i32, i32) {
    %c0_i32 = arith.constant 0 : i32
    %c0_i32_0 = arith.constant 0 : i32
    %c0_i32_1 = arith.constant 0 : i32
    return %c0_i32, %c0_i32_0 : i32, i32
  }
  func.func @transform_4(%arg0: i32) -> (i32, i32, i32) {
    %c0_i32 = arith.constant 0 : i32
    %c0_i32_0 = arith.constant 0 : i32
    %c0_i32_1 = arith.constant 0 : i32
    return %arg0, %c0_i32, %c0_i32_0 : i32, i32, i32
  }
}

module attributes {stable_mosaic.version = 11 : i64} {
  func.func @_ssim_kernel(%arg0: i32, %arg1: memref<4x16x16xf32, #tpu.memory_space<vmem>>, %arg2: memref<4x16x16xf32, #tpu.memory_space<vmem>>, %arg3: memref<16x16xf32, #tpu.memory_space<vmem>>, %arg4: memref<16x16xf32, #tpu.memory_space<vmem>>, %arg5: memref<1x1x4xf32, #tpu.memory_space<vmem>>) attributes {dimension_semantics = [#tpu.dimension_semantics<parallel>], iteration_bounds = array<i64: 2>, scalar_prefetch = 0 : i64, scratch_operands = 0 : i64, tpu.core_type = #tpu.core_type<tc>, window_params = [{transform_indices = @transform_0, window_bounds = array<i64: 4, 16, 16>}, {transform_indices = @transform_1, window_bounds = array<i64: 4, 16, 16>}, {pipeline_mode = #tpu.pipeline_mode<synchronous>, transform_indices = @transform_2, window_bounds = array<i64: 16, 16>}, {pipeline_mode = #tpu.pipeline_mode<synchronous>, transform_indices = @transform_3, window_bounds = array<i64: 16, 16>}, {transform_indices = @transform_4, window_bounds = array<i64: 1, 1, 4>}]} {
    %c0 = arith.constant 0 : index
    %c0_0 = arith.constant 0 : index
    %c0_1 = arith.constant 0 : index
    %0 = vector.load %arg1[%c0, %c0_0, %c0_1] : memref<4x16x16xf32, #tpu.memory_space<vmem>>, vector<4x16x16xf32>
    %c0_2 = arith.constant 0 : index
    %c0_3 = arith.constant 0 : index
    %c0_4 = arith.constant 0 : index
    %1 = vector.load %arg2[%c0_2, %c0_3, %c0_4] : memref<4x16x16xf32, #tpu.memory_space<vmem>>, vector<4x16x16xf32>
    %c0_5 = arith.constant 0 : index
    %c0_6 = arith.constant 0 : index
    %2 = vector.load %arg3[%c0_5, %c0_6] : memref<16x16xf32, #tpu.memory_space<vmem>>, vector<16x16xf32>
    %c0_7 = arith.constant 0 : index
    %c0_8 = arith.constant 0 : index
    %3 = vector.load %arg4[%c0_7, %c0_8] : memref<16x16xf32, #tpu.memory_space<vmem>>, vector<16x16xf32>
    %4 = vector.shape_cast %0 : vector<4x16x16xf32> to vector<64x16xf32>
    %cst = arith.constant dense<0.000000e+00> : vector<64x16xf32>
    %5 = tpu.matmul %4, %2, %cst {dimension_numbers = #tpu.dot_dimension_numbers<[1], [0], [0], [1], [0, 0, 1, 1], [], []>} : vector<64x16xf32>, vector<16x16xf32>, vector<64x16xf32> -> vector<64x16xf32>
    %6 = vector.shape_cast %5 : vector<64x16xf32> to vector<4x16x16xf32>
    %7 = tpu.transpose %6, [0, 2, 1] : vector<4x16x16xf32> -> vector<4x16x16xf32>
    %8 = vector.shape_cast %7 : vector<4x16x16xf32> to vector<64x16xf32>
    %cst_9 = arith.constant dense<0.000000e+00> : vector<64x16xf32>
    %9 = tpu.matmul %8, %3, %cst_9 {dimension_numbers = #tpu.dot_dimension_numbers<[1], [0], [0], [1], [0, 0, 1, 1], [], []>} : vector<64x16xf32>, vector<16x16xf32>, vector<64x16xf32> -> vector<64x16xf32>
    %10 = vector.shape_cast %9 : vector<64x16xf32> to vector<4x16x16xf32>
    %11 = vector.shape_cast %1 : vector<4x16x16xf32> to vector<64x16xf32>
    %cst_10 = arith.constant dense<0.000000e+00> : vector<64x16xf32>
    %12 = tpu.matmul %11, %2, %cst_10 {dimension_numbers = #tpu.dot_dimension_numbers<[1], [0], [0], [1], [0, 0, 1, 1], [], []>} : vector<64x16xf32>, vector<16x16xf32>, vector<64x16xf32> -> vector<64x16xf32>
    %13 = vector.shape_cast %12 : vector<64x16xf32> to vector<4x16x16xf32>
    %14 = tpu.transpose %13, [0, 2, 1] : vector<4x16x16xf32> -> vector<4x16x16xf32>
    %15 = vector.shape_cast %14 : vector<4x16x16xf32> to vector<64x16xf32>
    %cst_11 = arith.constant dense<0.000000e+00> : vector<64x16xf32>
    %16 = tpu.matmul %15, %3, %cst_11 {dimension_numbers = #tpu.dot_dimension_numbers<[1], [0], [0], [1], [0, 0, 1, 1], [], []>} : vector<64x16xf32>, vector<16x16xf32>, vector<64x16xf32> -> vector<64x16xf32>
    %17 = vector.shape_cast %16 : vector<64x16xf32> to vector<4x16x16xf32>
    %18 = arith.mulf %0, %0 : vector<4x16x16xf32>
    %19 = vector.shape_cast %18 : vector<4x16x16xf32> to vector<64x16xf32>
    %cst_12 = arith.constant dense<0.000000e+00> : vector<64x16xf32>
    %20 = tpu.matmul %19, %2, %cst_12 {dimension_numbers = #tpu.dot_dimension_numbers<[1], [0], [0], [1], [0, 0, 1, 1], [], []>} : vector<64x16xf32>, vector<16x16xf32>, vector<64x16xf32> -> vector<64x16xf32>
    %21 = vector.shape_cast %20 : vector<64x16xf32> to vector<4x16x16xf32>
    %22 = tpu.transpose %21, [0, 2, 1] : vector<4x16x16xf32> -> vector<4x16x16xf32>
    %23 = vector.shape_cast %22 : vector<4x16x16xf32> to vector<64x16xf32>
    %cst_13 = arith.constant dense<0.000000e+00> : vector<64x16xf32>
    %24 = tpu.matmul %23, %3, %cst_13 {dimension_numbers = #tpu.dot_dimension_numbers<[1], [0], [0], [1], [0, 0, 1, 1], [], []>} : vector<64x16xf32>, vector<16x16xf32>, vector<64x16xf32> -> vector<64x16xf32>
    %25 = vector.shape_cast %24 : vector<64x16xf32> to vector<4x16x16xf32>
    %26 = arith.mulf %1, %1 : vector<4x16x16xf32>
    %27 = vector.shape_cast %26 : vector<4x16x16xf32> to vector<64x16xf32>
    %cst_14 = arith.constant dense<0.000000e+00> : vector<64x16xf32>
    %28 = tpu.matmul %27, %2, %cst_14 {dimension_numbers = #tpu.dot_dimension_numbers<[1], [0], [0], [1], [0, 0, 1, 1], [], []>} : vector<64x16xf32>, vector<16x16xf32>, vector<64x16xf32> -> vector<64x16xf32>
    %29 = vector.shape_cast %28 : vector<64x16xf32> to vector<4x16x16xf32>
    %30 = tpu.transpose %29, [0, 2, 1] : vector<4x16x16xf32> -> vector<4x16x16xf32>
    %31 = vector.shape_cast %30 : vector<4x16x16xf32> to vector<64x16xf32>
    %cst_15 = arith.constant dense<0.000000e+00> : vector<64x16xf32>
    %32 = tpu.matmul %31, %3, %cst_15 {dimension_numbers = #tpu.dot_dimension_numbers<[1], [0], [0], [1], [0, 0, 1, 1], [], []>} : vector<64x16xf32>, vector<16x16xf32>, vector<64x16xf32> -> vector<64x16xf32>
    %33 = vector.shape_cast %32 : vector<64x16xf32> to vector<4x16x16xf32>
    %34 = arith.mulf %0, %1 : vector<4x16x16xf32>
    %35 = vector.shape_cast %34 : vector<4x16x16xf32> to vector<64x16xf32>
    %cst_16 = arith.constant dense<0.000000e+00> : vector<64x16xf32>
    %36 = tpu.matmul %35, %2, %cst_16 {dimension_numbers = #tpu.dot_dimension_numbers<[1], [0], [0], [1], [0, 0, 1, 1], [], []>} : vector<64x16xf32>, vector<16x16xf32>, vector<64x16xf32> -> vector<64x16xf32>
    %37 = vector.shape_cast %36 : vector<64x16xf32> to vector<4x16x16xf32>
    %38 = tpu.transpose %37, [0, 2, 1] : vector<4x16x16xf32> -> vector<4x16x16xf32>
    %39 = vector.shape_cast %38 : vector<4x16x16xf32> to vector<64x16xf32>
    %cst_17 = arith.constant dense<0.000000e+00> : vector<64x16xf32>
    %40 = tpu.matmul %39, %3, %cst_17 {dimension_numbers = #tpu.dot_dimension_numbers<[1], [0], [0], [1], [0, 0, 1, 1], [], []>} : vector<64x16xf32>, vector<16x16xf32>, vector<64x16xf32> -> vector<64x16xf32>
    %41 = vector.shape_cast %40 : vector<64x16xf32> to vector<4x16x16xf32>
    %42 = arith.mulf %10, %10 : vector<4x16x16xf32>
    %43 = arith.mulf %17, %17 : vector<4x16x16xf32>
    %44 = arith.mulf %10, %17 : vector<4x16x16xf32>
    %cst_18 = arith.constant 2.000000e+00 : f32
    %45 = vector.broadcast %cst_18 : f32 to vector<4x16x16xf32>
    %46 = arith.mulf %45, %44 : vector<4x16x16xf32>
    %cst_19 = arith.constant 9.99999974E-5 : f32
    %47 = vector.broadcast %cst_19 : f32 to vector<4x16x16xf32>
    %48 = arith.addf %46, %47 : vector<4x16x16xf32>
    %49 = arith.subf %41, %44 : vector<4x16x16xf32>
    %cst_20 = arith.constant 2.000000e+00 : f32
    %50 = vector.broadcast %cst_20 : f32 to vector<4x16x16xf32>
    %51 = arith.mulf %50, %49 : vector<4x16x16xf32>
    %cst_21 = arith.constant 8.99999984E-4 : f32
    %52 = vector.broadcast %cst_21 : f32 to vector<4x16x16xf32>
    %53 = arith.addf %51, %52 : vector<4x16x16xf32>
    %54 = arith.mulf %48, %53 : vector<4x16x16xf32>
    %55 = arith.addf %42, %43 : vector<4x16x16xf32>
    %cst_22 = arith.constant 9.99999974E-5 : f32
    %56 = vector.broadcast %cst_22 : f32 to vector<4x16x16xf32>
    %57 = arith.addf %55, %56 : vector<4x16x16xf32>
    %58 = arith.subf %25, %42 : vector<4x16x16xf32>
    %59 = arith.subf %33, %43 : vector<4x16x16xf32>
    %60 = arith.addf %58, %59 : vector<4x16x16xf32>
    %cst_23 = arith.constant 8.99999984E-4 : f32
    %61 = vector.broadcast %cst_23 : f32 to vector<4x16x16xf32>
    %62 = arith.addf %60, %61 : vector<4x16x16xf32>
    %63 = arith.mulf %57, %62 : vector<4x16x16xf32>
    %64 = arith.divf %54, %63 : vector<4x16x16xf32>
    %cst_24 = arith.constant dense<0.000000e+00> : vector<4x16xf32>
    %65 = vector.multi_reduction <add>, %64, %cst_24 [2] : vector<4x16x16xf32> to vector<4x16xf32>
    %cst_25 = arith.constant dense<0.000000e+00> : vector<4xf32>
    %66 = vector.multi_reduction <add>, %65, %cst_25 [1] : vector<4x16xf32> to vector<4xf32>
    %67 = vector.shape_cast %66 : vector<4xf32> to vector<4x1xf32>
    %68 = vector.shape_cast %67 : vector<4x1xf32> to vector<1x1x4xf32>
    %cst_26 = arith.constant 3.906250e-03 : f32
    %69 = vector.broadcast %cst_26 : f32 to vector<1x1x4xf32>
    %70 = arith.mulf %68, %69 : vector<1x1x4xf32>
    %c0_27 = arith.constant 0 : index
    %c0_28 = arith.constant 0 : index
    %c0_29 = arith.constant 0 : index
    %71 = vector.load %arg5[%c0_27, %c0_28, %c0_29] : memref<1x1x4xf32, #tpu.memory_space<vmem>>, vector<1x1x4xf32>
    tpu.vector_store %arg5[%c0_27, %c0_28, %c0_29], %70 {strides = array<i32>} : memref<1x1x4xf32, #tpu.memory_space<vmem>>, vector<1x1x4xf32>,
    return
  }
  func.func @transform_0(%arg0: i32) -> (i32, i32, i32) {
    %c0_i32 = arith.constant 0 : i32
    %c0_i32_0 = arith.constant 0 : i32
    %c0_i32_1 = arith.constant 0 : i32
    return %arg0, %c0_i32, %c0_i32_0 : i32, i32, i32
  }
  func.func @transform_1(%arg0: i32) -> (i32, i32, i32) {
    %c0_i32 = arith.constant 0 : i32
    %c0_i32_0 = arith.constant 0 : i32
    %c0_i32_1 = arith.constant 0 : i32
    return %arg0, %c0_i32, %c0_i32_0 : i32, i32, i32
  }
  func.func @transform_2(%arg0: i32) -> (i32, i32) {
    %c0_i32 = arith.constant 0 : i32
    %c0_i32_0 = arith.constant 0 : i32
    %c0_i32_1 = arith.constant 0 : i32
    return %c0_i32, %c0_i32_0 : i32, i32
  }
  func.func @transform_3(%arg0: i32) -> (i32, i32) {
    %c0_i32 = arith.constant 0 : i32
    %c0_i32_0 = arith.constant 0 : i32
    %c0_i32_1 = arith.constant 0 : i32
    return %c0_i32, %c0_i32_0 : i32, i32
  }
  func.func @transform_4(%arg0: i32) -> (i32, i32, i32) {
    %c0_i32 = arith.constant 0 : i32
    %c0_i32_0 = arith.constant 0 : i32
    %c0_i32_1 = arith.constant 0 : i32
    return %arg0, %c0_i32, %c0_i32_0 : i32, i32, i32
  }
}

</mosaic_0001>

<bundles_post_ra>
// kernel: tpu_custom_call.1
= control target key start
LH: loop header
LB: loop body
LE: loop exit
PB: predicated region body
PF: predicated region fallthrough
CT: control target
= control target key end

     0   :  { %s2933_s0 = inlined_call_operand.hbm [shape: f32[8,16,16], index: 0, kind: input, shape index: {}]   ;;  %s2934_s1 = inlined_call_operand.hbm [shape: f32[8,16,16], index: 1, kind: input, shape index: {}]   ;;  %s2935_s2 = inlined_call_operand.hbm [shape: f32[16,16], index: 2, kind: input, shape index: {}]   ;;  %s2936_s3 = inlined_call_operand.hbm [shape: f32[16,16], index: 3, kind: input, shape index: {}]   ;;  %s2937_s4 = inlined_call_operand.hbm [shape: f32[2,1,4], index: 4, kind: output, shape index: {}]  }
   0x1   :  { %2942 = sst [smem:[#allocation16_spill]] %s2933_s0 }
   0x2   :  { %2943 = sst [smem:[#allocation17_spill]] %s2935_s2 }
   0x3   :  { %2944 = sst [smem:[#allocation18_spill]] %s2936_s3 }
   0x4   :  { %9 = vsyncpa [#allocation3], 0 }
   0x5   :  { %11 = vsyncpa [#allocation3 + $0x1], 0 }
   0x6   :  { %12 = vsyncpa [#allocation6], 0 }
   0x7   :  { %14 = vsyncpa [#allocation6 + $0x1], 0 }
   0x8   :  { %15 = vsyncpa [#allocation9], 0 }
   0x9   :  { %16 = vsyncpa [#allocation4], 0 }
   0xa   :  { %18 = vsyncpa [#allocation4 + $0x1], 0  ;;  %s2493_s15 = smov 0   ;;  %s2495_s16 = smov 0  }
   0xb   :  { %s2497_s17 = smov 0   ;;  %s2499_s18 = smov 0  }
   0xc LB: > { %s2514_s19 = sadd.s32 4294967295, %s2462_s18   ;;  %s2065_s20 = sadd.s32 4294967294, %s2462_s18   ;;  %s2462_s18 = sphi %s2499_s18, %s2959_s18   ;;  %s2458_s17 = sphi %s2497_s17, %s2958_s17   ;;  %s2454_s16 = sphi %s2495_s16, %s2957_s16   ;;  %s2450_s15 = sphi %s2493_s15, %s2956_s15  }
   0xd   : > { %p44_p0 = scmp.ne.s32.totalorder %s2454_s16, %s2450_s15  ;;  %p45_p1 = scmp.eq.s32.totalorder %s2514_s19, 0 }
   0xe   : > { %p136_p2 = scmp.eq.s32.totalorder %s2514_s19, 1  ;;  %p142_p3 = scmp.eq.s32.totalorder %s2065_s20, 1 }
   0xf   : > { %p2523_p4 = por %p45_p1, %p44_p0  ;;  %p2066_p5 = scmp.ge.s32.totalorder %s2462_s18, 1 }
  0x10   : > { %p2528_p6 = por %p142_p3, %p44_p0  ;;  %p149_p7 = scmp.lt.s32.totalorder %s2462_s18, 3 }
  0x11   : > { %s2947_s2 = sld [smem:[#allocation17_spill]]  ;;  %s2464_s27 = smov [#allocation7]  }
  0x12   : > { %p2536_p8 = pnand %p2066_p5, %p149_p7  ;;  %s162_s28 = sshll.u32 %s2464_s27, 4  ;;  %s163_s28 = int_to_ptr.vmem [resolvable:$true] %s162_s28 }
  0x13   : > { %s2949_s3 = sld [smem:[#allocation18_spill]]  ;;  %s2938_s6 = smov 128  }
  0x14   : > { %p2187_p9 = pneg %p2536_p8  ;;  %s2940_s7 = smov 8  }
  0x15   : > { %s2467_s8 = smov [#allocation8]   ;;  %s2555_s10 = sadd.s32 1, %s2462_s18  }
  0x16   : > { %p2188_p10 = pnand %p2187_p9, %p45_p1  ;;  %s176_s9 = sshll.u32 %s2467_s8, 4  ;;  %s177_s9 = int_to_ptr.vmem [resolvable:$true] %s176_s9 }
  0x17   : > { %s160_s25 = sshll.u32 %s2947_s2, 4  ;;  %s31_s11 = sadd.s32 1, %s2458_s17  ;;  %s161_s25 = int_to_ptr.hbm [resolvable:$true] %s160_s25 }
  0x18   : > { %2190 = dma.hbm_to_vmem [thread:$0]  (!%p2188_p10), %s161_s25, 256, %s163_s28, [#allocation6], %s2938_s6, %s2938_s6, %s2940_s7  }
  0x19   : > { %s174_s5 = sshll.u32 %s2949_s3, 4  ;;  %s28_s12 = ssub.s32 %s2462_s18, %s2555_s10  ;;  %s175_s5 = int_to_ptr.hbm [resolvable:$true] %s174_s5 }
  0x1a   : > { %2193 = dma.hbm_to_vmem [thread:$0]  (!%p2188_p10), %s175_s5, 256, %s177_s9, [#allocation9], %s2938_s6, %s2938_s6, %s2940_s7  }
  0x1b   : > { %p38_p12 = scmp.ne.s32.totalorder %s2458_s17, %s2454_s16  ;;  %p29_p13 = scmp.eq.s32.totalorder %s28_s12, 0 }
  0x1c   : > { %p39_p0 = scmp.eq.s32.totalorder %s2462_s18, 0  ;;  %p2207_p5 = scmp.lt.s32.totalorder %s2462_s18, 2 }
  0x1d   : > { %p2565_p3 = por %p136_p2, %p38_p12  ;;  %s190_s20 = sand.u32 1, %s2458_s17  }
  0x1e   : > { %s2571_s14 = scalar_select %p29_p13, %s2458_s17, %s31_s11  }
  0x1f   : > { %p40_p7 = por %p39_p0, %p38_p12  ;;  %s2574_s23 = sshll.u32 %s190_s20, 6 }
  0x20   : > { %s2166_s24 = sshll.u32 %s2462_s18, 6  ;;  %s2951_s0 = sld [smem:[#allocation16_spill]] }
  0x21   : > { %s194_s29 = scalar_lea.vmem [#allocation2], %s2574_s23  ;;  %p2581_p2 = pnand %p2207_p5, %p40_p7 }
  0x22   : > { %s203_s30 = sshll.u32 %s194_s29, 4  ;;  %s223_s12 = scalar_lea.hbm %s2934_s1, %s2166_s24  ;;  %s204_s30 = int_to_ptr.vmem [resolvable:$true] %s203_s30 }
  0x23   : > { %s224_s6 = sshll.u32 %s223_s12, 4  ;;  %s191_s7 = scalar_lea.sflag [#allocation3], %s190_s20  ;;  %s225_s6 = int_to_ptr.hbm [resolvable:$true] %s224_s6 }
  0x24   : > { %p2328_p10 = pneg %p2581_p2 }
  0x26   : > { %s200_s28 = scalar_lea.hbm %s2951_s0, %s2166_s24  ;;  %s2331_s29 = scalar_lea.hbm %s2951_s0, 128 }
  0x27   : > { %s201_s5 = sshll.u32 %s200_s28, 4  ;;  %s202_s5 = int_to_ptr.hbm [resolvable:$true] %s201_s5 }
  0x28   : > { %s2324_s2 = sshra.s32 %s202_s5, 4  ;;  %s2325_s2 = int_to_ptr.hbm [resolvable:$true] %s2324_s2 }
  0x29   : > { %s2326_s25 = scalar_lea.hbm %s2325_s2, 64  ;;  %p2332_p0 = scmp.lt.s32.totalorder %s2325_s2, %s2951_s0 }
  0x2a   : > { %p2327_p9 = scmp.ne.s32.totalorder %s2325_s2, %s2326_s25  ;;  %p2333_p5 = scmp.lt.s32.totalorder %s2331_s29, %s2326_s25 }
  0x2c   : > { %p2329_p12 = pnand %p2328_p10, %p2327_p9  ;;  %p2334_p7 = por %p2333_p5, %p2332_p0 }
  0x2e   : > { %p2330_p13 = pneg %p2329_p12 }
  0x30   : > { %p2335_p11 = pnand %p2334_p7, %p2330_p13 }
  0x32   : > { %2338 = shalt.err (!%p2335_p11)
}
  0x33   : > { %s2953_s20 = smov 8   ;;  %s2954_s24 = smov 128  }
  0x34   : > { %2197 = dma.hbm_to_vmem [thread:$0]  (!%p2581_p2), %s202_s5, 1024, %s204_s30, %s191_s7, %s2954_s24, %s2954_s24, %s2953_s20  }
  0x35   : > { %s217_s12 = scalar_lea.vmem [#allocation5], %s2574_s23  ;;  %s213_s28 = sand.u32 1, %s2462_s18  }
  0x36   : > { %s226_s27 = sshll.u32 %s217_s12, 4  ;;  %s214_s9 = scalar_lea.sflag [#allocation6], %s213_s28  ;;  %s227_s27 = int_to_ptr.vmem [resolvable:$true] %s226_s27 }
  0x37   : > { %s2354_s2 = sshra.s32 %s225_s6, 4  ;;  %s2361_s0 = scalar_lea.hbm %s2934_s1, 128  ;;  %s2355_s2 = int_to_ptr.hbm [resolvable:$true] %s2354_s2 }
  0x38   : > { %s2356_s25 = scalar_lea.hbm %s2355_s2, 64  ;;  %p2362_p13 = scmp.lt.s32.totalorder %s2355_s2, %s2934_s1 }
  0x39   : > { %p2357_p9 = scmp.ne.s32.totalorder %s2355_s2, %s2356_s25  ;;  %p2363_p0 = scmp.lt.s32.totalorder %s2361_s0, %s2356_s25 }
  0x3b   : > { %p2359_p11 = pnand %p2357_p9, %p2328_p10  ;;  %p2364_p5 = por %p2363_p0, %p2362_p13 }
  0x3d   : > { %p2360_p12 = pneg %p2359_p11 }
  0x3f   : > { %p2365_p7 = pnand %p2364_p5, %p2360_p12 }
  0x41   : > { %2368 = shalt.err (!%p2365_p7)
}
  0x42   : > { %2200 = dma.hbm_to_vmem [thread:$0]  (!%p2581_p2), %s225_s6, 1024, %s227_s27, %s214_s9, %s2954_s24, %s2954_s24, %s2953_s20  }
  0x43   : > { %238 = sbr.rel (%p2536_p8) target bundleno = 937 (0x3a9), region = 36  ;;  %s2623_s23 = sand.u32 (!%p2536_p8), 1, %s2454_s16  }
  0x44   : > { %s2079_s3 = sshll.u32 (!%p2536_p8), %s2623_s23, 6  ;;  %s241_s0 = scalar_lea.sflag (!%p2536_p8), [#allocation3], %s2623_s23 }
  0x45   : > { %s2627_s30 = scalar_lea.vmem (!%p2536_p8), [#allocation2], %s2079_s3 }
  0x48   : > { %2429 = dma.done.wait (%p2523_p4), %s241_s0, 1024  }
  0x49   : > { %2431 = vsyncadd (%p2523_p4), %s241_s0, 4294966272  ;;  %s250_s6 = sand.u32 1, %s2514_s19   ;;  %s2634_s5 = scalar_lea.vmem [#allocation5], %s2079_s3 }
  0x4a   : > { %s251_s26 = scalar_lea.sflag [#allocation6], %s250_s6 }
  0x4b   : > { %2433 = dma.done.wait (%p2523_p4), %s251_s26, 1024  }
  0x4c   : > { %2435 = vsyncadd (%p2523_p4), %s251_s26, 4294966272 }
  0x4d   : > { %2437 = dma.done.wait (%p45_p1), [#allocation6], 256  }
  0x4e   : > { %2439 = vsyncadd (%p45_p1), [#allocation6], 4294967040 }
  0x4f   : > { %2441 = dma.done.wait (%p45_p1), [#allocation9], 256  }
  0x50   : > { %2443 = vsyncadd (%p45_p1), [#allocation9], 4294967040  ;;  %v313_v0 = vld [vmem:[#allocation7 + $0x8] sm:$0xff]  ;;  %v312_v1 = vld [vmem:[#allocation7] sm:$0xff]  ;;  %vm316_vm0 = vcmask 130048   ;;  %s1953_s20 = scalar_lea.hbm %s2937_s4, %s2514_s19  ;;  %s293_s24 = scalar_lea.vmem [#allocation10], %s2623_s23 }
  0x51   : > { %2169 = vmatpush.msra.mxu2 %v313_v0  ;;  %v2649_v2 = vld [vmem:[%s2627_s30 + $0x20] sm:$0xff]  ;;  %355 = vmatpush.msra.mxu0 %v313_v0  ;;  %v2656_v4 = vld [vmem:[%s2627_s30 + $0x28] sm:$0xff]  ;;  %v2663_v6 = vld [vmem:[%s2627_s30 + $0x30] sm:$0xff]  ;;  %s1955_s12 = sshll.u32 %s293_s24, 4  ;;  %s1957_s27 = sshll.u32 %s1953_s20, 4  ;;  %s1956_s12 = int_to_ptr.vmem [resolvable:$true] %s1955_s12  ;;  %s1958_s27 = int_to_ptr.hbm [resolvable:$true] %s1957_s27 }
  0x52   : > { %v296_v3 = vld [vmem:[%s2627_s30] sm:$0xff]  ;;  %v297_v5 = vld [vmem:[%s2627_s30 + $0x8] sm:$0xff]  ;;  %v298_v7 = vld [vmem:[%s2627_s30 + $0x10] sm:$0xff]  ;;  %v837_v18 = vmul.f32 %v2649_v2, %v2649_v2  ;;  %v838_v20 = vmul.f32 %v2656_v4, %v2656_v4  ;;  %v839_v22 = vmul.f32 %v2663_v6, %v2663_v6  ;;  %s1945_s28 = scalar_lea.sflag [#allocation4], %s2623_s23  ;;  %s2398_s9 = sshra.s32 %s1958_s27, 4  ;;  %s2399_s9 = int_to_ptr.hbm [resolvable:$true] %s2398_s9 }
  0x53   : > { %2170 = vmatpush.msra.mxu2 %v312_v1  ;;  %356 = vmatpush.msra.mxu0 %v312_v1  ;;  %v2670_v8 = vld [vmem:[%s2627_s30 + $0x38] sm:$0xff]  ;;  %v833_v10 = vmul.f32 %v296_v3, %v296_v3  ;;  %v304_v11 = vld [vmem:[%s2634_s5] sm:$0xff]  ;;  %v834_v12 = vmul.f32 %v297_v5, %v297_v5  ;;  %v305_v13 = vld [vmem:[%s2634_s5 + $0x8] sm:$0xff]  ;;  %v835_v14 = vmul.f32 %v298_v7, %v298_v7  ;;  %s2400_s2 = scalar_lea.hbm %s2399_s9, 1  ;;  %s2404_s29 = scalar_lea.hbm %s2937_s4, 2 }
  0x54   : > { %2087 = vmatmul.msk.f32.vlgmr.msra.gmra.mxu2 %vm316_vm0, %v2649_v2  ;;  %2083 = vmatmul.msk.f32.vlgmr.msra.gmra.mxu0 %vm316_vm0, %v296_v3  ;;  %v299_v9 = vld [vmem:[%s2627_s30 + $0x18] sm:$0xff]  ;;  %v306_v15 = vld [vmem:[%s2634_s5 + $0x10] sm:$0xff]  ;;  %v308_v19 = vld [vmem:[%s2634_s5 + $0x20] sm:$0xff]  ;;  %v840_v24 = vmul.f32 %v2670_v8, %v2670_v8  ;;  %v1099_v26 = vmul.f32 %v304_v11, %v304_v11  ;;  %v1365_v27 = vmul.f32 %v304_v11, %v296_v3  ;;  %p2401_p1 = scmp.ne.s32.totalorder %s2399_s9, %s2400_s2  ;;  %p2405_p2 = scmp.lt.s32.totalorder %s2399_s9, %s2937_s4 }
  0x55   : > { %613 = vmatpush.msrb.mxu2 %v313_v0  ;;  %879 = vmatpush.msrb.mxu0 %v313_v0  ;;  %v836_v16 = vmul.f32 %v299_v9, %v299_v9  ;;  %v307_v17 = vld [vmem:[%s2634_s5 + $0x18] sm:$0xff]  ;;  %v309_v21 = vld [vmem:[%s2634_s5 + $0x28] sm:$0xff]  ;;  %v310_v23 = vld [vmem:[%s2634_s5 + $0x30] sm:$0xff]  ;;  %v1100_v28 = vmul.f32 %v305_v13, %v305_v13  ;;  %v1366_v29 = vmul.f32 %v305_v13, %v297_v5  ;;  %p2406_p10 = scmp.lt.s32.totalorder %s2404_s29, %s2400_s2 }
  0x56   : > { %v311_v25 = vld [vmem:[%s2634_s5 + $0x38] sm:$0xff]  ;;  %v1101_v30 = vmul.f32 %v306_v15, %v306_v15  ;;  %v1367_v31 = vmul.f32 %v306_v15, %v298_v7  ;;  %v1102_v32 = vmul.f32 %v307_v17, %v307_v17  ;;  %v1368_v33 = vmul.f32 %v307_v17, %v299_v9  ;;  %p2402_p4 = pnand %p2401_p1, %p2565_p3 }
  0x57   : > { %614 = vmatpush.msrb.mxu2 %v312_v1  ;;  %880 = vmatpush.msrb.mxu0 %v312_v1  ;;  %v1103_v34 = vmul.f32 %v308_v19, %v308_v19  ;;  %v1369_v35 = vmul.f32 %v308_v19, %v2649_v2  ;;  %v1104_v38 = vmul.f32 %v309_v21, %v309_v21  ;;  %p2407_p9 = por %p2406_p10, %p2405_p2 }
  0x58   : > { %v1370_v39 = vmul.f32 %v309_v21, %v2656_v4  ;;  %v1105_v42 = vmul.f32 %v310_v23, %v310_v23  ;;  %v1371_v43 = vmul.f32 %v310_v23, %v2663_v6  ;;  %v1106_v46 = vmul.f32 %v311_v25, %v311_v25  ;;  %p2403_p8 = pneg %p2402_p4 }
  0x59   : > { %1145 = vmatpush.msra.mxu2 %v313_v0  ;;  %1411 = vmatpush.msra.mxu0 %v313_v0  ;;  %v1372_v47 = vmul.f32 %v311_v25, %v2670_v8 }
  0x5a   : > { %p2408_p11 = pnand %p2407_p9, %p2403_p8 }
  0x5b   : > { %1146 = vmatpush.msra.mxu2 %v312_v1  ;;  %1412 = vmatpush.msra.mxu0 %v312_v1 }
  0x5c   : > { %2088 = vmatmul.msk.f32.gmra.mxu2 %vm316_vm0, %v2656_v4  ;;  %2084 = vmatmul.msk.f32.gmra.mxu0 %vm316_vm0, %v297_v5 }
  0x64   : > { %2089 = vmatmul.msk.f32.gmra.mxu2 %vm316_vm0, %v2663_v6  ;;  %2085 = vmatmul.msk.f32.gmra.mxu0 %vm316_vm0, %v298_v7 }
  0x6c   : > { %2090 = vmatmul.msk.f32.gmra.mxu2 %vm316_vm0, %v2670_v8  ;;  %2086 = vmatmul.msk.f32.gmra.mxu0 %vm316_vm0, %v299_v9 }
  0x74   : > { %2099 = vmatmul.msk.f32.vlgmr.msrb.gmra.mxu2 %vm316_vm0, %v304_v11  ;;  %2115 = vmatmul.msk.f32.vlgmr.msrb.gmra.mxu0 %vm316_vm0, %v833_v10  ;;  %v315_v10 = vld [vmem:[#allocation8 + $0x8] sm:$0xff]  ;;  %v314_v11 = vld [vmem:[#allocation8] sm:$0xff] }
  0x75   : > { %2171 = vmatpush.msra.mxu3 %v315_v10  ;;  %548 = vmatpush.msra.mxu1 %v315_v10 }
  0x77   : > { %2172 = vmatpush.msra.mxu3 %v314_v11  ;;  %549 = vmatpush.msra.mxu1 %v314_v11 }
  0x79   : > { %806 = vmatpush.msrb.mxu3 %v315_v10  ;;  %1072 = vmatpush.msrb.mxu1 %v315_v10 }
  0x7b   : > { %807 = vmatpush.msrb.mxu3 %v314_v11  ;;  %1073 = vmatpush.msrb.mxu1 %v314_v11 }
  0x7c   : > { %2100 = vmatmul.msk.f32.gmra.mxu2 %vm316_vm0, %v305_v13  ;;  %2116 = vmatmul.msk.f32.gmra.mxu0 %vm316_vm0, %v834_v12 }
  0x84   : > { %2101 = vmatmul.msk.f32.gmra.mxu2 %vm316_vm0, %v306_v15  ;;  %2117 = vmatmul.msk.f32.gmra.mxu0 %vm316_vm0, %v835_v14 }
  0x8c   : > { %2102 = vmatmul.msk.f32.gmra.mxu2 %vm316_vm0, %v307_v17  ;;  %2118 = vmatmul.msk.f32.gmra.mxu0 %vm316_vm0, %v836_v16 }
  0x94   : > { %2103 = vmatmul.msk.f32.gmra.mxu2 %vm316_vm0, %v308_v19  ;;  %2119 = vmatmul.msk.f32.gmra.mxu0 %vm316_vm0, %v837_v18 }
  0x9c   : > { %2104 = vmatmul.msk.f32.gmra.mxu2 %vm316_vm0, %v309_v21  ;;  %2120 = vmatmul.msk.f32.gmra.mxu0 %vm316_vm0, %v838_v20 }
  0xa4   : > { %2105 = vmatmul.msk.f32.gmra.mxu2 %vm316_vm0, %v310_v23  ;;  %2121 = vmatmul.msk.f32.gmra.mxu0 %vm316_vm0, %v839_v22 }
  0xac   : > { %2106 = vmatmul.msk.f32.gmra.mxu2 %vm316_vm0, %v311_v25  ;;  %2122 = vmatmul.msk.f32.gmra.mxu0 %vm316_vm0, %v840_v24 }
  0xb4   : > { %2131 = vmatmul.msk.f32.vlgmr.msra.gmra.mxu2 %vm316_vm0, %v1099_v26  ;;  %2147 = vmatmul.msk.f32.vlgmr.msra.gmra.mxu0 %vm316_vm0, %v1365_v27 }
  0xbc   : > { %2132 = vmatmul.msk.f32.gmra.mxu2 %vm316_vm0, %v1100_v28  ;;  %2148 = vmatmul.msk.f32.gmra.mxu0 %vm316_vm0, %v1366_v29 }
  0xc4   : > { %2133 = vmatmul.msk.f32.gmra.mxu2 %vm316_vm0, %v1101_v30  ;;  %2149 = vmatmul.msk.f32.gmra.mxu0 %vm316_vm0, %v1367_v31 }
  0xcc   : > { %2134 = vmatmul.msk.f32.gmra.mxu2 %vm316_vm0, %v1102_v32  ;;  %2150 = vmatmul.msk.f32.gmra.mxu0 %vm316_vm0, %v1368_v33 }
  0xd1   : > { %v358_v36 = vpop.f32.mrf.mxu0 }
  0xd2   : > { %382 = vxpose.xlu2.b32.start [1/2] (short) (narrow) %v358_v36, 16 }
  0xd4   : > { %2135 = vmatmul.msk.f32.gmra.mxu2 %vm316_vm0, %v1103_v34  ;;  %2151 = vmatmul.msk.f32.gmra.mxu0 %vm316_vm0, %v1369_v35 }
  0xd7   : > { %v370_v37 = vpop.f32.mrf.mxu2 }
  0xd8   : > { %446 = vxpose.xlu0.b32.start [1/2] (short) (narrow) %v370_v37, 16 }
  0xd9   : > { %v361_v40 = vpop.f32.mrf.mxu0 }
  0xda   : > { %383 = vxpose.xlu2.b32.end [2/2] (short) (narrow) %v361_v40, 16 }
  0xdc   : > { %2136 = vmatmul.msk.f32.gmra.mxu2 %vm316_vm0, %v1104_v38  ;;  %2152 = vmatmul.msk.f32.gmra.mxu0 %vm316_vm0, %v1370_v39 }
  0xdf   : > { %v373_v41 = vpop.f32.mrf.mxu2 }
  0xe0   : > { %447 = vxpose.xlu0.b32.end [2/2] (short) (narrow) %v373_v41, 16 }
  0xe1   : > { %v364_v44 = vpop.f32.mrf.mxu0 }
  0xe4   : > { %2137 = vmatmul.msk.f32.gmra.mxu2 %vm316_vm0, %v1105_v42  ;;  %2153 = vmatmul.msk.f32.gmra.mxu0 %vm316_vm0, %v1371_v43 }
  0xe7   : > { %v376_v45 = vpop.f32.mrf.mxu2 }
  0xe8   : > { %478 = vxpose.xlu1.b32.start [1/2] (short) (narrow) %v376_v45, 16 }
  0xe9   : > { %v367_v48 = vpop.f32.mrf.mxu0 }
  0xec   : > { %2138 = vmatmul.msk.f32.gmra.mxu2 %vm316_vm0, %v1106_v46  ;;  %2154 = vmatmul.msk.f32.gmra.mxu0 %vm316_vm0, %v1372_v47 }
  0xef   : > { %v379_v49 = vpop.f32.mrf.mxu2 }
  0xf0   : > { %479 = vxpose.xlu1.b32.end [2/2] (short) (narrow) %v379_v49, 16 }
  0xf1   : > { %v882_v50 = vpop.f32.mrf.mxu0 }
  0xf7   : > { %v616_v51 = vpop.f32.mrf.mxu2 }
  0xf8   : > { %640 = vxpose.xlu0.b32.start [1/2] (short) (narrow) %v616_v51, 16  ;;  %414 = vxpose.xlu1.b32.start [1/2] (short) (narrow) %v364_v44, 16 }
  0xf9   : > { %v885_v52 = vpop.f32.mrf.mxu0 }
  0xff   : > { %v619_v53 = vpop.f32.mrf.mxu2 }
 0x100   : > { %641 = vxpose.xlu0.b32.end [2/2] (short) (narrow) %v619_v53, 16  ;;  %415 = vxpose.xlu1.b32.end [2/2] (short) (narrow) %v367_v48, 16 }
 0x101   : > { %v888_v54 = vpop.f32.mrf.mxu0 }
 0x107   : > { %v622_v55 = vpop.f32.mrf.mxu2 }
 0x108   : > { %672 = vxpose.xlu2.b32.start [1/2] (short) (narrow) %v622_v55, 16  ;;  %906 = vxpose.xlu0.b32.start [1/2] (short) (narrow) %v882_v50, 16 }
 0x109   : > { %v891_v56 = vpop.f32.mrf.mxu0 }
 0x10f   : > { %v625_v57 = vpop.f32.mrf.mxu2 }
 0x110   : > { %673 = vxpose.xlu2.b32.end [2/2] (short) (narrow) %v625_v57, 16  ;;  %907 = vxpose.xlu0.b32.end [2/2] (short) (narrow) %v885_v52, 16 }
 0x111   : > { %v894_v58 = vpop.f32.mrf.mxu0 }
 0x117   : > { %v628_v59 = vpop.f32.mrf.mxu2 }
 0x118   : > { %704 = vxpose.xlu1.b32.start [1/2] (short) (narrow) %v628_v59, 16  ;;  %938 = vxpose.xlu2.b32.start [1/2] (short) (narrow) %v888_v54, 16 }
 0x119   : > { %v897_v60 = vpop.f32.mrf.mxu0 }
 0x11f   : > { %v631_v61 = vpop.f32.mrf.mxu2 }
 0x120   : > { %705 = vxpose.xlu1.b32.end [2/2] (short) (narrow) %v631_v61, 16  ;;  %939 = vxpose.xlu2.b32.end [2/2] (short) (narrow) %v891_v56, 16 }
 0x121   : > { %v900_v62 = vpop.f32.mrf.mxu0 }
 0x127   : > { %v634_v63 = vpop.f32.mrf.mxu2 }
 0x128   : > { %736 = vxpose.xlu0.b32.start [1/2] (short) (narrow) %v634_v63, 16  ;;  %970 = vxpose.xlu1.b32.start [1/2] (short) (narrow) %v894_v58, 16 }
 0x129   : > { %v903_v0 = vpop.f32.mrf.mxu0 }
 0x12f   : > { %v637_v1 = vpop.f32.mrf.mxu2 }
 0x130   : > { %737 = vxpose.xlu0.b32.end [2/2] (short) (narrow) %v637_v1, 16  ;;  %971 = vxpose.xlu1.b32.end [2/2] (short) (narrow) %v897_v60, 16 }
 0x131   : > { %v1414_v2 = vpop.f32.mrf.mxu0 }
 0x137   : > { %v1148_v3 = vpop.f32.mrf.mxu2 }
 0x138   : > { %1172 = vxpose.xlu2.b32.start [1/2] (short) (narrow) %v1148_v3, 16  ;;  %1002 = vxpose.xlu0.b32.start [1/2] (short) (narrow) %v900_v62, 16 }
 0x139   : > { %v1417_v4 = vpop.f32.mrf.mxu0 }
 0x13f   : > { %v1151_v5 = vpop.f32.mrf.mxu2 }
 0x140   : > { %1173 = vxpose.xlu2.b32.end [2/2] (short) (narrow) %v1151_v5, 16  ;;  %1003 = vxpose.xlu0.b32.end [2/2] (short) (narrow) %v903_v0, 16 }
 0x141   : > { %v1420_v6 = vpop.f32.mrf.mxu0 }
 0x147   : > { %v1154_v7 = vpop.f32.mrf.mxu2 }
 0x148   : > { %1204 = vxpose.xlu1.b32.start [1/2] (short) (narrow) %v1154_v7, 16  ;;  %1438 = vxpose.xlu2.b32.start [1/2] (short) (narrow) %v1414_v2, 16 }
 0x149   : > { %v1423_v8 = vpop.f32.mrf.mxu0 }
 0x14f   : > { %v1157_v9 = vpop.f32.mrf.mxu2 }
 0x150   : > { %1205 = vxpose.xlu1.b32.end [2/2] (short) (narrow) %v1157_v9, 16  ;;  %1439 = vxpose.xlu2.b32.end [2/2] (short) (narrow) %v1417_v4, 16 }
 0x151   : > { %v1426_v12 = vpop.f32.mrf.mxu0 }
 0x157   : > { %v1160_v13 = vpop.f32.mrf.mxu2 }
 0x158   : > { %1236 = vxpose.xlu0.b32.start [1/2] (short) (narrow) %v1160_v13, 16  ;;  %1470 = vxpose.xlu1.b32.start [1/2] (short) (narrow) %v1420_v6, 16 }
 0x159   : > { %v1429_v14 = vpop.f32.mrf.mxu0 }
 0x15f   : > { %v1163_v15 = vpop.f32.mrf.mxu2 }
 0x160   : > { %1237 = vxpose.xlu0.b32.end [2/2] (short) (narrow) %v1163_v15, 16  ;;  %1471 = vxpose.xlu1.b32.end [2/2] (short) (narrow) %v1423_v8, 16 }
 0x161   : > { %v1432_v16 = vpop.f32.mrf.mxu0 }
 0x167   : > { %v1166_v17 = vpop.f32.mrf.mxu2 }
 0x168   : > { %1502 = vxpose.xlu0.b32.start [1/2] (short) (narrow) %v1426_v12, 16  ;;  %1268 = vxpose.xlu2.b32.start [1/2] (short) (narrow) %v1166_v17, 16 }
 0x169   : > { %1534 = vxpose.xlu1.b32.start [1/2] (short) (narrow) %v1432_v16, 16  ;;  %v1435_v19 = vpop.f32.mrf.mxu0 }
 0x16b   : > { %v398_v18 = vpop.trf.xlu2 }
 0x16c   : > { %2091 = vmatmul.msk.f32.vlgmr.msra.gmra.mxu1 %vm316_vm0, %v398_v18 }
 0x16d   : > { %1604 = vmatpush.msra.mxu1 %v315_v10 }
 0x16f   : > { %v1169_v20 = vpop.f32.mrf.mxu2  ;;  %1605 = vmatpush.msra.mxu1 %v314_v11 }
 0x170   : > { %1503 = vxpose.xlu0.b32.end [2/2] (short) (narrow) %v1429_v14, 16  ;;  %1269 = vxpose.xlu2.b32.end [2/2] (short) (narrow) %v1169_v20, 16 }
 0x171   : > { %1535 = vxpose.xlu1.b32.end [2/2] (short) (narrow) %v1435_v19, 16 }
 0x173   : > { %v399_v21 = vpop.trf.xlu2 }
 0x174   : > { %2092 = vmatmul.msk.f32.gmra.mxu1 %vm316_vm0, %v399_v21 }
 0x17c   : > { %v462_v22 = vpop.trf.xlu0 }
 0x17d   : > { %2095 = vmatmul.msk.f32.vlgmr.msra.gmra.mxu3 %vm316_vm0, %v462_v22 }
 0x17e   : > { %1338 = vmatpush.msra.mxu3 %v315_v10 }
 0x180   : > { %1339 = vmatpush.msra.mxu3 %v314_v11 }
 0x184   : > { %v463_v23 = vpop.trf.xlu0 }
 0x185   : > { %2096 = vmatmul.msk.f32.gmra.mxu3 %vm316_vm0, %v463_v23 }
 0x18c   : > { %v494_v24 = vpop.trf.xlu1 }
 0x18d   : > { %2097 = vmatmul.msk.f32.gmra.mxu3 %vm316_vm0, %v494_v24 }
 0x194   : > { %v495_v25 = vpop.trf.xlu1 }
 0x195   : > { %2098 = vmatmul.msk.f32.gmra.mxu3 %vm316_vm0, %v495_v25 }
 0x19c   : > { %v656_v26 = vpop.trf.xlu0  ;;  %v430_v27 = vpop.trf.xlu1 }
 0x19d   : > { %2093 = vmatmul.msk.f32.gmra.mxu1 %vm316_vm0, %v430_v27  ;;  %2107 = vmatmul.msk.f32.vlgmr.msrb.gmra.mxu3 %vm316_vm0, %v656_v26 }
 0x1a1   : > { %v688_v28 = vpop.trf.xlu2 }
 0x1a4   : > { %v657_v29 = vpop.trf.xlu0  ;;  %v431_v30 = vpop.trf.xlu1 }
 0x1a5   : > { %2094 = vmatmul.msk.f32.gmra.mxu1 %vm316_vm0, %v431_v30  ;;  %2108 = vmatmul.msk.f32.gmra.mxu3 %vm316_vm0, %v657_v29 }
 0x1a9   : > { %v689_v32 = vpop.trf.xlu2 }
 0x1ac   : > { %v922_v31 = vpop.trf.xlu0 }
 0x1ad   : > { %2109 = vmatmul.msk.f32.gmra.mxu3 %vm316_vm0, %v688_v28  ;;  %2123 = vmatmul.msk.f32.vlgmr.msrb.gmra.mxu1 %vm316_vm0, %v922_v31 }
 0x1b1   : > { %v954_v34 = vpop.trf.xlu2 }
 0x1b4   : > { %v923_v33 = vpop.trf.xlu0 }
 0x1b5   : > { %2110 = vmatmul.msk.f32.gmra.mxu3 %vm316_vm0, %v689_v32  ;;  %2124 = vmatmul.msk.f32.gmra.mxu1 %vm316_vm0, %v923_v33 }
 0x1b9   : > { %v955_v36 = vpop.trf.xlu2 }
 0x1bc   : > { %v720_v35 = vpop.trf.xlu1 }
 0x1bd   : > { %2111 = vmatmul.msk.f32.gmra.mxu3 %vm316_vm0, %v720_v35  ;;  %2125 = vmatmul.msk.f32.gmra.mxu1 %vm316_vm0, %v954_v34 }
 0x1c4   : > { %v721_v37 = vpop.trf.xlu1 }
 0x1c5   : > { %2112 = vmatmul.msk.f32.gmra.mxu3 %vm316_vm0, %v721_v37  ;;  %2126 = vmatmul.msk.f32.gmra.mxu1 %vm316_vm0, %v955_v36 }
 0x1cc   : > { %v752_v38 = vpop.trf.xlu0  ;;  %v986_v39 = vpop.trf.xlu1 }
 0x1cd   : > { %2113 = vmatmul.msk.f32.gmra.mxu3 %vm316_vm0, %v752_v38  ;;  %2127 = vmatmul.msk.f32.gmra.mxu1 %vm316_vm0, %v986_v39 }
 0x1d1   : > { %v1188_v40 = vpop.trf.xlu2 }
 0x1d4   : > { %v753_v41 = vpop.trf.xlu0  ;;  %v987_v42 = vpop.trf.xlu1 }
 0x1d5   : > { %2114 = vmatmul.msk.f32.gmra.mxu3 %vm316_vm0, %v753_v41  ;;  %2128 = vmatmul.msk.f32.gmra.mxu1 %vm316_vm0, %v987_v42 }
 0x1d9   : > { %v1189_v44 = vpop.trf.xlu2 }
 0x1dc   : > { %v1018_v43 = vpop.trf.xlu0 }
 0x1dd   : > { %2129 = vmatmul.msk.f32.gmra.mxu1 %vm316_vm0, %v1018_v43  ;;  %2139 = vmatmul.msk.f32.vlgmr.msra.gmra.mxu3 %vm316_vm0, %v1188_v40 }
 0x1e1   : > { %v1454_v46 = vpop.trf.xlu2 }
 0x1e4   : > { %v1019_v45 = vpop.trf.xlu0 }
 0x1e5   : > { %2130 = vmatmul.msk.f32.gmra.mxu1 %vm316_vm0, %v1019_v45  ;;  %2140 = vmatmul.msk.f32.gmra.mxu3 %vm316_vm0, %v1189_v44 }
 0x1e9   : > { %v1455_v48 = vpop.trf.xlu2  ;;  %v551_v55 = vpop.f32.mrf.mxu1 }
 0x1ea   : > { %v1631_v28 = vmul.f32 %v551_v55, %v551_v55 }
 0x1ec   : > { %v1220_v47 = vpop.trf.xlu1 }
 0x1ed   : > { %2141 = vmatmul.msk.f32.gmra.mxu3 %vm316_vm0, %v1220_v47  ;;  %2155 = vmatmul.msk.f32.vlgmr.msra.gmra.mxu1 %vm316_vm0, %v1454_v46 }
 0x1f1   : > { %v554_v60 = vpop.f32.mrf.mxu1 }
 0x1f2   : > { %v1632_v38 = vmul.f32 %v554_v60, %v554_v60 }
 0x1f4   : > { %v1221_v49 = vpop.trf.xlu1 }
 0x1f5   : > { %2142 = vmatmul.msk.f32.gmra.mxu3 %vm316_vm0, %v1221_v49  ;;  %2156 = vmatmul.msk.f32.gmra.mxu1 %vm316_vm0, %v1455_v48 }
 0x1fc   : > { %v1252_v50 = vpop.trf.xlu0  ;;  %v1486_v51 = vpop.trf.xlu1 }
 0x1fd   : > { %2143 = vmatmul.msk.f32.gmra.mxu3 %vm316_vm0, %v1252_v50  ;;  %2157 = vmatmul.msk.f32.gmra.mxu1 %vm316_vm0, %v1486_v51 }
 0x200   : > { %v2760_v52 = vpop.f32.mrf.mxu3 }
 0x201   : > { %v1284_v57 = vpop.trf.xlu2 }
 0x204   : > { %v1253_v53 = vpop.trf.xlu0  ;;  %v1487_v54 = vpop.trf.xlu1 }
 0x205   : > { %2144 = vmatmul.msk.f32.gmra.mxu3 %vm316_vm0, %v1253_v53  ;;  %2158 = vmatmul.msk.f32.gmra.mxu1 %vm316_vm0, %v1487_v54 }
 0x208   : > { %v2764_v56 = vpop.f32.mrf.mxu3 }
 0x209   : > { %v1285_v61 = vpop.trf.xlu2 }
 0x20c   : > { %v1518_v58 = vpop.trf.xlu0 }
 0x20d   : > { %2145 = vmatmul.msk.f32.gmra.mxu3 %vm316_vm0, %v1284_v57  ;;  %2159 = vmatmul.msk.f32.gmra.mxu1 %vm316_vm0, %v1518_v58  ;;  %v1550_v0 = vpop.trf.xlu1 }
 0x210   : > { %v2768_v59 = vpop.f32.mrf.mxu3 }
 0x214   : > { %v1519_v62 = vpop.trf.xlu0 }
 0x215   : > { %2146 = vmatmul.msk.f32.gmra.mxu3 %vm316_vm0, %v1285_v61  ;;  %2160 = vmatmul.msk.f32.gmra.mxu1 %vm316_vm0, %v1519_v62  ;;  %v1551_v5 = vpop.trf.xlu1 }
 0x218   : > { %v2772_v63 = vpop.f32.mrf.mxu3 }
 0x21a   : > { %v557_v1 = vpop.f32.mrf.mxu1 }
 0x21b   : > { %v1633_v51 = vmul.f32 %v557_v1, %v557_v1 }
 0x21d   : > { %2161 = vmatmul.msk.f32.gmra.mxu1 %vm316_vm0, %v1550_v0 }
 0x220   : > { %v809_v2 = vpop.f32.mrf.mxu3 }
 0x221   : > { %v1647_v3 = vmul.f32 %v809_v2, %v551_v55  ;;  %v1639_v27 = vmul.f32 %v809_v2, %v809_v2 }
 0x222   : > { %v2775_v4 = vpop.f32.mrf.mxu1 }
 0x223   : > { %v1703_v30 = vadd.f32 %v1639_v27, %v1631_v28  ;;  %v1655_v62 = vmul.f32 2.0, %v1647_v3 }
 0x225   : > { %2162 = vmatmul.msk.f32.gmra.mxu1 %vm316_vm0, %v1551_v5  ;;  %v1711_v35 = vadd.f32 0.0001, %v1703_v30  ;;  %v1663_v30 = vadd.f32 0.0001, %v1655_v62 }
 0x228   : > { %v812_v6 = vpop.f32.mrf.mxu3 }
 0x229   : > { %v2778_v7 = vmul.f32 %v812_v6, %v554_v60  ;;  %v1640_v36 = vmul.f32 %v812_v6, %v812_v6 }
 0x22a   : > { %v1075_v8 = vpop.f32.mrf.mxu1 }
 0x22b   : > { %v1719_v31 = vsub.f32 %v1075_v8, %v1631_v28  ;;  %v1704_v41 = vadd.f32 %v1640_v36, %v1632_v38  ;;  %v1634_v28 = vmul.f32 %v2775_v4, %v2775_v4 }
 0x22d   : > { %v1712_v47 = vadd.f32 0.0001, %v1704_v41 }
 0x230   : > { %v815_v9 = vpop.f32.mrf.mxu3 }
 0x231   : > { %v2780_v10 = vmul.f32 %v815_v9, %v557_v1  ;;  %v1641_v48 = vmul.f32 %v815_v9, %v815_v9 }
 0x232   : > { %v1078_v11 = vpop.f32.mrf.mxu1 }
 0x233   : > { %v1720_v42 = vsub.f32 %v1078_v11, %v1632_v38  ;;  %v1705_v58 = vadd.f32 %v1641_v48, %v1633_v51 }
 0x238   : > { %v818_v12 = vpop.f32.mrf.mxu3 }
 0x239   : > { %v2783_v13 = vmul.f32 %v818_v12, %v2775_v4  ;;  %v1642_v5 = vmul.f32 %v818_v12, %v818_v12 }
 0x23a   : > { %v1081_v14 = vpop.f32.mrf.mxu1 }
 0x23b   : > { %v1721_v60 = vsub.f32 %v1081_v14, %v1633_v51 }
 0x240   : > { %v2785_v15 = vpop.f32.mrf.mxu3 }
 0x241   : > { %v2789_v16 = vmul.f32 %v2785_v15, %v2760_v52 }
 0x242   : > { %v2791_v17 = vpop.f32.mrf.mxu1 }
 0x243   : > { %v1722_v4 = vsub.f32 %v2791_v17, %v1634_v28 }
 0x248   : > { %v2793_v18 = vpop.f32.mrf.mxu3 }
 0x249   : > { %v2797_v19 = vmul.f32 %v2793_v18, %v2764_v56 }
 0x24a   : > { %v2799_v20 = vpop.f32.mrf.mxu1 }
 0x250   : > { %v2801_v21 = vpop.f32.mrf.mxu3 }
 0x251   : > { %v2805_v22 = vmul.f32 %v2801_v21, %v2768_v59 }
 0x252   : > { %v2807_v23 = vpop.f32.mrf.mxu1 }
 0x258   : > { %v2809_v24 = vpop.f32.mrf.mxu3 }
 0x259   : > { %v2813_v25 = vmul.f32 %v2809_v24, %v2772_v63 }
 0x25a   : > { %v2815_v26 = vpop.f32.mrf.mxu1 }
 0x260   : > { %v1341_v29 = vpop.f32.mrf.mxu3 }
 0x261   : > { %v1727_v32 = vsub.f32 %v1341_v29, %v1639_v27  ;;  %v1713_v29 = vadd.f32 0.0001, %v1705_v58 }
 0x262   : > { %v2817_v33 = vpop.f32.mrf.mxu1 }
 0x263   : > { %v1735_v34 = vadd.f32 %v1727_v32, %v1719_v31  ;;  %v1706_v32 = vadd.f32 %v1642_v5, %v1634_v28 }
 0x265   : > { %v1743_v37 = vadd.f32 0.0009, %v1735_v34 }
 0x267   : > { %v1751_v39 = vmul.f32 %v1743_v37, %v1711_v35 }
 0x268   : > { %v1344_v40 = vpop.f32.mrf.mxu3 }
 0x269   : > { %2248 = vrcp.f32 %v1751_v39  ;;  %v1728_v43 = vsub.f32 %v1344_v40, %v1640_v36  ;;  %v1768_v8 = vand.u32 2147483647, %v1751_v39  ;;  %v1770_v9 = vand.u32 2147483648, %v1751_v39 }
 0x26a   : > { %v1607_v44 = vpop.f32.mrf.mxu1  ;;  %vm1764_vm2 = vweird.f32 %v1751_v39 }
 0x26b   : > { %v1736_v45 = vadd.f32 %v1728_v43, %v1720_v42  ;;  %v1671_v46 = vsub.f32 %v1607_v44, %v1647_v3  ;;  %vm1769_vm4 = vcmp.eq.f32.partialorder %v1768_v8, 8.507059e+37  ;;  %v1771_v12 = vor.u32 1.1754944e-38, %v1770_v9 }
 0x26c   : > { %v1643_v43 = vmul.f32 %v2785_v15, %v2785_v15 }
 0x26d   : > { %v1744_v49 = vadd.f32 0.0009, %v1736_v45  ;;  %v1679_v54 = vmul.f32 2.0, %v1671_v46 }
 0x26f   : > { %v2249_v50 = vpop.eup %2248  ;;  %v2819_v53 = vmul.f32 %v1744_v49, %v1712_v47  ;;  %v1687_v11 = vadd.f32 0.0009, %v1679_v54 }
 0x270   : > { %v1347_v55 = vpop.f32.mrf.mxu3  ;;  %v1760_v57 = vmul.f32 %v2249_v50, %v1751_v39  ;;  %vm1765_vm1 = vweird.f32 %v2249_v50  ;;  %v1656_v39 = vmul.f32 2.0, %v2778_v7 }
 0x271   : > { %2250 = vrcp.f32 %v2819_v53  ;;  %v1729_v61 = vsub.f32 %v1347_v55, %v1641_v48  ;;  %vm1766_vm3 = vmor %vm1764_vm2, %vm1765_vm1  ;;  %v1695_v35 = vmul.f32 %v1687_v11, %v1663_v30  ;;  %v1783_v49 = vand.u32 2147483647, %v2819_v53 }
 0x272   : > { %v1610_v0 = vpop.f32.mrf.mxu1  ;;  %v1761_v2 = vsub.f32 1.0, %v1760_v57  ;;  %v1714_v55 = vadd.f32 0.0001, %v1706_v32  ;;  %v1664_v57 = vadd.f32 0.0001, %v1656_v39  ;;  %vm1779_vm6 = vweird.f32 %v2819_v53 }
 0x273   : > { %v1737_v6 = vadd.f32 %v1729_v61, %v1721_v60  ;;  %v1672_v1 = vsub.f32 %v1610_v0, %v2778_v7  ;;  %v1635_v7 = vmul.f32 %v2760_v52, %v2760_v52  ;;  %vm1784_vm8 = vcmp.eq.f32.partialorder %v1783_v49, 8.507059e+37 }
 0x274   : > { %v1762_v27 = vmul.f32 %v2249_v50, %v1761_v2  ;;  %v1645_v49 = vmul.f32 %v2801_v21, %v2801_v21 }
 0x275   : > { %v1745_v14 = vadd.f32 0.0009, %v1737_v6  ;;  %v1680_v36 = vmul.f32 2.0, %v1672_v1  ;;  %v1707_v61 = vadd.f32 %v1643_v43, %v1635_v7  ;;  %v1723_v9 = vsub.f32 %v2799_v20, %v1635_v7 }
 0x276   : > { %v1763_v31 = vadd.f32 %v2249_v50, %v1762_v27  ;;  %v1644_v27 = vmul.f32 %v2793_v18, %v2793_v18 }
 0x277   : > { %v2251_v3 = vpop.eup %2250  ;;  %v2825_v34 = vmul.f32 %v1745_v14, %v1713_v29  ;;  %v1688_v17 = vadd.f32 0.0009, %v1680_v36  ;;  %v1715_v36 = vadd.f32 0.0001, %v1707_v61 }
 0x278   : > { %v1350_v37 = vpop.f32.mrf.mxu3  ;;  %v1767_v38 = vsel %vm1766_vm3, %v2249_v50, %v1763_v31  ;;  %v1775_v40 = vmul.f32 %v2251_v3, %v2819_v53  ;;  %v1785_v50 = vand.u32 2147483648, %v2819_v53  ;;  %vm1780_vm5 = vweird.f32 %v2251_v3 }
 0x279   : > { %2252 = vrcp.f32 %v2825_v34  ;;  %v1730_v41 = vsub.f32 %v1350_v37, %v1642_v5  ;;  %v1772_v42 = vsel %vm1769_vm4, %v1771_v12, %v1767_v38  ;;  %vm1781_vm7 = vmor %vm1779_vm6, %vm1780_vm5  ;;  %v1696_v5 = vmul.f32 %v1688_v17, %v1664_v57 }
 0x27a   : > { %v1613_v44 = vpop.f32.mrf.mxu1  ;;  %v1773_v45 = vmul.f32 %v1772_v42, %v1695_v35  ;;  %v1776_v46 = vsub.f32 1.0, %v1775_v40  ;;  %v1786_v2 = vor.u32 1.1754944e-38, %v1785_v50  ;;  %v1657_v53 = vmul.f32 2.0, %v2780_v10 }
 0x27b   : > { %v1738_v47 = vadd.f32 %v1730_v41, %v1722_v4  ;;  %v1673_v48 = vsub.f32 %v1613_v44, %v2780_v10  ;;  %v1800_v32 = vand.u32 2147483648, %v2825_v34  ;;  %v1636_v10 = vmul.f32 %v2764_v56, %v2764_v56 }
 0x27c   : > { %v1879_v51 = vsel %vm316_vm0, %v1773_v45, 0.0  ;;  %v1777_v54 = vmul.f32 %v2251_v3, %v1776_v46  ;;  %v1665_v37 = vadd.f32 0.0001, %v1657_v53  ;;  %vm1794_vm10 = vweird.f32 %v2825_v34 }
 0x27d   : > { %v1746_v15 = vadd.f32 0.0009, %v1738_v47  ;;  %1880 = vadd.xlane.f32.xlu2 %v1879_v51  ;;  %v1681_v0 = vmul.f32 2.0, %v1673_v48  ;;  %v1708_v4 = vadd.f32 %v1644_v27, %v1636_v10  ;;  %v1801_v42 = vor.u32 1.1754944e-38, %v1800_v32 }
 0x27e   : > { %v1778_v58 = vadd.f32 %v2251_v3, %v1777_v54  ;;  %v1724_v46 = vsub.f32 %v2807_v23, %v1636_v10 }
 0x27f   : > { %v2253_v60 = vpop.eup %2252  ;;  %v2840_v62 = vmul.f32 %v1746_v15, %v1714_v55  ;;  %v1689_v30 = vadd.f32 0.0009, %v1681_v0 }
 0x280   : > { %v1353_v6 = vpop.f32.mrf.mxu3  ;;  %v1782_v8 = vsel %vm1781_vm7, %v2251_v3, %v1778_v58  ;;  %v1790_v52 = vmul.f32 %v2253_v60, %v2825_v34  ;;  %v1798_v3 = vand.u32 2147483647, %v2825_v34  ;;  %vm1795_vm9 = vweird.f32 %v2253_v60 }
 0x281   : > { %2254 = vrcp.f32 %v2840_v62  ;;  %v1731_v11 = vsub.f32 %v1353_v6, %v1643_v43  ;;  %v1787_v1 = vsel %vm1784_vm8, %v1786_v2, %v1782_v8  ;;  %vm1796_vm11 = vmor %vm1794_vm10, %vm1795_vm9  ;;  %v1697_v39 = vmul.f32 %v1689_v30, %v1665_v37 }
 0x282   : > { %v1616_v28 = vpop.f32.mrf.mxu1  ;;  %v1788_v29 = vmul.f32 %v1787_v1, %v1696_v5  ;;  %v1791_v14 = vsub.f32 1.0, %v1790_v52  ;;  %vm1799_vm12 = vcmp.eq.f32.partialorder %v1798_v3, 8.507059e+37  ;;  %v1658_v34 = vmul.f32 2.0, %v2783_v13 }
 0x283   : > { %v1739_v31 = vadd.f32 %v1731_v11, %v1723_v9  ;;  %v1674_v20 = vsub.f32 %v1616_v28, %v2783_v13  ;;  %v1813_v55 = vand.u32 2147483647, %v2840_v62  ;;  %v1815_v15 = vand.u32 2147483648, %v2840_v62 }
 0x284   : > { %v1882_v12 = vsel %vm316_vm0, %v1788_v29, 0.0  ;;  %v1792_v35 = vmul.f32 %v2253_v60, %v1791_v14  ;;  %v1637_v13 = vmul.f32 %v2768_v59, %v2768_v59  ;;  %v1666_v61 = vadd.f32 0.0001, %v1658_v34 }
 0x285   : > { %v1747_v18 = vadd.f32 0.0009, %v1739_v31  ;;  %1883 = vadd.xlane.f32.xlu0 %v1882_v12  ;;  %v1682_v43 = vmul.f32 2.0, %v1674_v20  ;;  %vm1809_vm14 = vweird.f32 %v2840_v62  ;;  %v1816_v52 = vor.u32 1.1754944e-38, %v1815_v15 }
 0x286   : > { %v1793_v38 = vadd.f32 %v2253_v60, %v1792_v35  ;;  %v1709_v5 = vadd.f32 %v1645_v49, %v1637_v13  ;;  %vm1814_vm1 = vcmp.eq.f32.partialorder %v1813_v55, 8.507059e+37  ;;  %v1725_v53 = vsub.f32 %v2815_v26, %v1637_v13 }
 0x287   : > { %v2255_v40 = vpop.eup %2254  ;;  %v2855_v41 = vmul.f32 %v1747_v18, %v1715_v36  ;;  %v1690_v23 = vadd.f32 0.0009, %v1682_v43  ;;  %v1646_v29 = vmul.f32 %v2809_v24, %v2809_v24 }
 0x288   : > { %v1356_v44 = vpop.f32.mrf.mxu3  ;;  %v1797_v45 = vsel %vm1796_vm11, %v2253_v60, %v1793_v38  ;;  %v1805_v56 = vmul.f32 %v2255_v40, %v2840_v62  ;;  %vm1810_vm13 = vweird.f32 %v2255_v40  ;;  %v1716_v60 = vadd.f32 0.0001, %v1708_v4 }
 0x289   : > { %2256 = vrcp.f32 %v2855_v41  ;;  %v1732_v47 = vsub.f32 %v1356_v44, %v1644_v27  ;;  %v1802_v48 = vsel %vm1799_vm12, %v1801_v42, %v1797_v45  ;;  %vm1811_vm15 = vmor %vm1809_vm14, %vm1810_vm13  ;;  %v1698_v9 = vmul.f32 %v1690_v23, %v1666_v61 }
 0x28a   : > { %v1619_v50 = vpop.f32.mrf.mxu1  ;;  %v1803_v17 = vmul.f32 %v1802_v48, %v1697_v39  ;;  %v1806_v51 = vsub.f32 1.0, %v1805_v56  ;;  %v1659_v62 = vmul.f32 2.0, %v2789_v16  ;;  %v1828_v20 = vand.u32 2147483647, %v2855_v41 }
 0x28b   : > { %v1740_v54 = vadd.f32 %v1732_v47, %v1724_v46  ;;  %v1675_v7 = vsub.f32 %v1619_v50, %v2789_v16  ;;  %v1830_v12 = vand.u32 2147483648, %v2855_v41  ;;  %v1638_v16 = vmul.f32 %v2772_v63, %v2772_v63 }
 0x28c   : > { %v1885_v57 = vsel %vm316_vm0, %v1803_v17, 0.0  ;;  %v1807_v58 = vmul.f32 %v2255_v40, %v1806_v51  ;;  %v1717_v36 = vadd.f32 0.0001, %v1709_v5  ;;  %v1667_v18 = vadd.f32 0.0001, %v1659_v62 }
 0x28d   : > { %v1748_v21 = vadd.f32 0.0009, %v1740_v54  ;;  %1886 = vadd.xlane.f32.xlu1 %v1885_v57  ;;  %v1683_v8 = vmul.f32 2.0, %v1675_v7  ;;  %vm1824_vm3 = vweird.f32 %v2855_v41  ;;  %vm1829_vm5 = vcmp.eq.f32.partialorder %v1828_v20, 8.507059e+37 }
 0x28e   : > { %v1808_v0 = vadd.f32 %v2255_v40, %v1807_v58  ;;  %v1831_v42 = vor.u32 1.1754944e-38, %v1830_v12  ;;  %v1726_v63 = vsub.f32 %v2817_v33, %v1638_v16  ;;  %v1660_v48 = vmul.f32 2.0, %v2797_v19 }
 0x28f   : > { %v2257_v2 = vpop.eup %2256  ;;  %v2870_v6 = vmul.f32 %v1748_v21, %v1716_v60  ;;  %v1691_v3 = vadd.f32 0.0009, %v1683_v8  ;;  %v1661_v8 = vmul.f32 2.0, %v2805_v22  ;;  %v1662_v12 = vmul.f32 2.0, %v2813_v25 }
 0x290   : > { %v1359_v11 = vpop.f32.mrf.mxu3  ;;  %v1812_v1 = vsel %vm1811_vm15, %v2255_v40, %v1808_v0  ;;  %v1820_v59 = vmul.f32 %v2257_v2, %v2855_v41  ;;  %vm1825_vm2 = vweird.f32 %v2257_v2  ;;  %v1710_v40 = vadd.f32 %v1646_v29, %v1638_v16 }
 0x291   : > { %2258 = vrcp.f32 %v2870_v6  ;;  %v1733_v27 = vsub.f32 %v1359_v11, %v1645_v49  ;;  %v1817_v28 = vsel %vm1814_vm1, %v1816_v52, %v1812_v1  ;;  %vm1826_vm4 = vmor %vm1824_vm3, %vm1825_vm2  ;;  %v1699_v39 = vmul.f32 %v1691_v3, %v1667_v18 }
 0x292   : > { %v1622_v14 = vpop.f32.mrf.mxu1  ;;  %v1818_v30 = vmul.f32 %v1817_v28, %v1698_v9  ;;  %v1821_v31 = vsub.f32 1.0, %v1820_v59  ;;  %v1843_v51 = vand.u32 2147483647, %v2870_v6  ;;  %v1845_v54 = vand.u32 2147483648, %v2870_v6 }
 0x293   : > { %v1741_v32 = vadd.f32 %v1733_v27, %v1725_v53  ;;  %v1676_v26 = vsub.f32 %v1622_v14, %v2797_v19  ;;  %v1718_v33 = vadd.f32 0.0001, %v1710_v40  ;;  %v1668_v57 = vadd.f32 0.0001, %v1660_v48 }
 0x294   : > { %v1888_v35 = vsel %vm316_vm0, %v1818_v30, 0.0  ;;  %v1822_v10 = vmul.f32 %v2257_v2, %v1821_v31  ;;  %vm1839_vm7 = vweird.f32 %v2870_v6  ;;  %v1846_v21 = vor.u32 1.1754944e-38, %v1845_v54 }
 0x295   : > { %v1749_v24 = vadd.f32 0.0009, %v1741_v32  ;;  %1889 = vadd.xlane.f32.xlu1 %v1888_v35  ;;  %v1684_v43 = vmul.f32 2.0, %v1676_v26  ;;  %vm1844_vm9 = vcmp.eq.f32.partialorder %v1843_v51, 8.507059e+37  ;;  %v1669_v62 = vadd.f32 0.0001, %v1661_v8 }
 0x296   : > { %v1823_v37 = vadd.f32 %v2257_v2, %v1822_v10  ;;  %vm1916_vm3 = vcmask 130112  }
 0x297   : > { %v2259_v38 = vpop.eup %2258  ;;  %v1757_v4 = vmul.f32 %v1749_v24, %v1717_v36  ;;  %v1692_v7 = vadd.f32 0.0009, %v1684_v43 }
 0x298   : > { %v1362_v44 = vpop.f32.mrf.mxu3  ;;  %v1827_v45 = vsel %vm1826_vm4, %v2257_v2, %v1823_v37  ;;  %v1835_v56 = vmul.f32 %v2259_v38, %v2870_v6  ;;  %vm1840_vm6 = vweird.f32 %v2259_v38  ;;  %v1670_v37 = vadd.f32 0.0001, %v1662_v12 }
 0x299   : > { %2260 = vrcp.f32 %v1757_v4  ;;  %v1734_v46 = vsub.f32 %v1362_v44, %v1646_v29  ;;  %v1832_v47 = vsel %vm1829_vm5, %v1831_v42, %v1827_v45  ;;  %vm1841_vm8 = vmor %vm1839_vm7, %vm1840_vm6  ;;  %v1700_v61 = vmul.f32 %v1692_v7, %v1668_v57 }
 0x29a   : > { %v1625_v41 = vpop.f32.mrf.mxu1  ;;  %v1833_v34 = vmul.f32 %v1832_v47, %v1699_v39  ;;  %v1836_v49 = vsub.f32 1.0, %v1835_v56  ;;  %v1858_v59 = vand.u32 2147483647, %v1757_v4  ;;  %v1860_v53 = vand.u32 2147483648, %v1757_v4 }
 0x29b   : > { %v1742_v50 = vadd.f32 %v1734_v46, %v1726_v63  ;;  %v1677_v17 = vsub.f32 %v1625_v41, %v2805_v22  ;;  %vm1854_vm11 = vweird.f32 %v1757_v4  ;;  %v1911_v63 = vlaneseq }
 0x29c   : > { %v1891_v55 = vsel %vm316_vm0, %v1833_v34, 0.0  ;;  %v1837_v15 = vmul.f32 %v2259_v38, %v1836_v49  ;;  %vm1859_vm13 = vcmp.eq.f32.partialorder %v1858_v59, 8.507059e+37  ;;  %v1861_v22 = vor.u32 1.1754944e-38, %v1860_v53 }
 0x29d   : > { %v1750_v23 = vadd.f32 0.0009, %v1742_v50  ;;  %1892 = vadd.xlane.f32.xlu2 %v1891_v55  ;;  %v1685_v60 = vmul.f32 2.0, %v1677_v17  ;;  %v1912_v47 = vand.u32 127, %v1911_v63  ;;  %vm1929_vm4 = vcmask 1042434  }
 0x29e   : > { %v1838_v19 = vadd.f32 %v2259_v38, %v1837_v15  ;;  %vm1931_vm5 = vcmask 1043459   ;;  %vm1934_vm6 = vcmask 125952   ;;  %vm1942_vm7 = vcmask 24576  }
 0x29f   : > { %v2261_v58 = vpop.eup %2260  ;;  %v1758_v13 = vmul.f32 %v1750_v23, %v1718_v33  ;;  %v1693_v1 = vadd.f32 0.0009, %v1685_v60  ;;  %v1914_v41 = vadd.s32 4294967288, %v1912_v47 }
 0x2a0   : > { %v1842_v0 = vsel %vm1841_vm8, %v2259_v38, %v1838_v19  ;;  %v1850_v2 = vmul.f32 %v2261_v58, %v1757_v4  ;;  %vm1855_vm10 = vweird.f32 %v2261_v58 }
 0x2a1   : > { %2262 = vrcp.f32 %v1758_v13  ;;  %v1847_v5 = vsel %vm1844_vm9, %v1846_v21, %v1842_v0  ;;  %vm1856_vm12 = vmor %vm1854_vm11, %vm1855_vm10  ;;  %v1701_v30 = vmul.f32 %v1693_v1, %v1669_v62  ;;  %v1873_v10 = vand.u32 2147483647, %v1758_v13 }
 0x2a2   : > { %v1628_v52 = vpop.f32.mrf.mxu1  ;;  %v1848_v9 = vmul.f32 %v1847_v5, %v1700_v61  ;;  %v1851_v11 = vsub.f32 1.0, %v1850_v2  ;;  %v1875_v16 = vand.u32 2147483648, %v1758_v13  ;;  %vm1869_vm15 = vweird.f32 %v1758_v13 }
 0x2a3   : > { %v1678_v6 = vsub.f32 %v1628_v52, %v2813_v25  ;;  %vm1874_vm2 = vcmp.eq.f32.partialorder %v1873_v10, 8.507059e+37 }
 0x2a4   : > { %v1894_v27 = vsel %vm316_vm0, %v1848_v9, 0.0  ;;  %v1852_v28 = vmul.f32 %v2261_v58, %v1851_v11  ;;  %v1876_v40 = vor.u32 1.1754944e-38, %v1875_v16 }
 0x2a5   : > { %1895 = vadd.xlane.f32.xlu1 %v1894_v27  ;;  %v1686_v31 = vmul.f32 2.0, %v1678_v6 }
 0x2a6   : > { %v1853_v29 = vadd.f32 %v2261_v58, %v1852_v28 }
 0x2a7   : > { %v2263_v14 = vpop.eup %2262  ;;  %v1694_v36 = vadd.f32 0.0009, %v1686_v31 }
 0x2a8   : > { %v1857_v3 = vsel %vm1856_vm12, %v2261_v58, %v1853_v29  ;;  %v1865_v32 = vmul.f32 %v2263_v14, %v1758_v13  ;;  %vm1870_vm14 = vweird.f32 %v2263_v14 }
 0x2a9   : > { %v1862_v20 = vsel %vm1859_vm13, %v1861_v22, %v1857_v3  ;;  %vm1871_vm1 = vmor %vm1869_vm15, %vm1870_vm14  ;;  %v1702_v4 = vmul.f32 %v1694_v36, %v1670_v37 }
 0x2aa   : > { %v1863_v26 = vmul.f32 %v1862_v20, %v1701_v30  ;;  %v1866_v35 = vsub.f32 1.0, %v1865_v32 }
 0x2ac   : > { %v1897_v24 = vsel %vm316_vm0, %v1863_v26, 0.0  ;;  %v1867_v18 = vmul.f32 %v2263_v14, %v1866_v35 }
 0x2ad   : > { %1898 = vadd.xlane.f32.xlu2 %v1897_v24 }
 0x2ae   : > { %v1868_v38 = vadd.f32 %v2263_v14, %v1867_v18 }
 0x2b0   : > { %v1872_v42 = vsel %vm1871_vm1, %v2263_v14, %v1868_v38 }
 0x2b1   : > { %v1877_v39 = vsel %vm1874_vm2, %v1876_v40, %v1872_v42 }
 0x2b2   : > { %v1878_v25 = vmul.f32 %v1877_v39, %v1702_v4 }
 0x2b4   : > { %v1900_v43 = vsel %vm316_vm0, %v1878_v25, 0.0  ;;  %vm1927_vm0 = vcmask 1041409  }
 0x2b5   : > { %1901 = vadd.xlane.f32.xlu1 %v1900_v43 }
 0x2f0   : > { %v1881_v45 = vpop.xlane.xlu2 %1880 }
 0x2f1   : > { %v1913_v55 = vperm.slane %v1881_v45, %v1912_v47 }
 0x2f8   : > { %v1884_v34 = vpop.xlane.xlu0 %1883 }
 0x2f9   : > { %v1915_v17 = vperm.slane %v1884_v34, %v1914_v41 }
 0x2fb   : > { %v1917_v57 = vsel %vm1916_vm3, %v1915_v17, %v1913_v55 }
 0x300   : > { %v1887_v44 = vpop.xlane.xlu1 %1886 }
 0x301   : > { %v1918_v51 = vperm.slane %v1887_v44, %v1912_v47 }
 0x308   : > { %v1890_v56 = vpop.xlane.xlu1 %1889 }
 0x309   : > { %v1919_v49 = vperm.slane %v1890_v56, %v1914_v41 }
 0x30b   : > { %v1920_v15 = vsel %vm1916_vm3, %v1919_v49, %v1918_v51 }
 0x30c   : > { %v1928_v13 = vsel %vm1927_vm0, %v1920_v15, %v1917_v57 }
 0x310   : > { %v1893_v46 = vpop.xlane.xlu2 %1892 }
 0x311   : > { %v1921_v54 = vperm.slane %v1893_v46, %v1912_v47 }
 0x318   : > { %v1896_v48 = vpop.xlane.xlu1 %1895 }
 0x319   : > { %v1922_v50 = vperm.slane %v1896_v48, %v1914_v41 }
 0x31b   : > { %v1923_v33 = vsel %vm1916_vm3, %v1922_v50, %v1921_v54 }
 0x31c   : > { %v1930_v21 = vsel %vm1929_vm4, %v1923_v33, %v1928_v13 }
 0x320   : > { %v1899_v7 = vpop.xlane.xlu2 %1898 }
 0x321   : > { %v1924_v19 = vperm.slane %v1899_v7, %v1912_v47 }
 0x328   : > { %v1902_v23 = vpop.xlane.xlu1 %1901 }
 0x329   : > { %v1925_v58 = vperm.slane %v1902_v23, %v1914_v41 }
 0x32b   : > { %v1926_v60 = vsel %vm1916_vm3, %v1925_v58, %v1924_v19 }
 0x32c   : > { %v1932_v61 = vsel %vm1931_vm5, %v1926_v60, %v1930_v21 }
 0x32d   : > { %v1935_v0 = vsel %vm1934_vm6, %v1932_v61, 0.0 }
 0x32e   : > { %1936 = vadd.xlane.f32.xlu0 %v1935_v0 }
 0x3a1   : > { %v1937_v2 = vpop.xlane.xlu0 %1936 }
 0x3a2   : > { %v1938_v5 = vmul.f32 0.00390625, %v1937_v2 }
 0x3a4   : > { %v1940_v8 = vperm.slane %v1938_v5, %v1912_v47 }
 0x3a6   : > { %1943 = vst.msk [vmem:[%s293_s24] sm:$0x1] %vm1942_vm7, %v1940_v8 }
 0x3a7   : > { %2411 = shalt.err (!%p2408_p11)
}
 0x3a8   : > { %2185 = dma.vmem_to_hbm [thread:$0]  (%p2565_p3), %s1956_s12, 16, %s1958_s27, %s1945_s28  }
 0x3a9 PF: > { %s1969_s23 = sand.u32 1, %s2450_s15   ;;  %p2955_p12 = scmp.ge.s32.totalorder %s2462_s18, 2 }
 0x3aa   : > { %s1970_s3 = scalar_lea.sflag [#allocation4], %s1969_s23 }
 0x3ab   : > { %p2202_p13 = pnand %p2955_p12, %p2528_p6 }
 0x3ad   : > { %p2203_p0 = pneg %p2202_p13 }
 0x3af   : > { %2445 = dma.done.wait (%p2203_p0), %s1970_s3, 16  }
 0x3b0   : > { %2447 = vsyncadd (%p2203_p0), %s1970_s3, 4294967280  ;;  %p21_p5 = scmp.ge.s32.totalorder %s2555_s10, 4   ;;  %s2956_s15 = smov %s2454_s16 }
 0x3b1   : > { %s2957_s16 = smov %s2458_s17  ;;  %s2958_s17 = smov %s2571_s14 }
 0x3b2   : > { %s2959_s18 = smov %s2555_s10  ;;  %23 = sbr.rel (!%p21_p5) target bundleno = 12 (0xc), region = 102 }
 0x3b7   :  { %1975 = vsyncpa [#allocation3], 1 }
 0x3b8   :  { %1977 = vsyncpa [#allocation3 + $0x1], 1 }
 0x3b9   :  { %1978 = vsyncpa [#allocation6], 1 }
 0x3ba   :  { %1980 = vsyncpa [#allocation6 + $0x1], 1 }
 0x3bb   :  { %1981 = vsyncpa [#allocation9], 1 }
 0x3bc   :  { %1982 = vsyncpa [#allocation4], 1 }
 0x3bd   :  { %1984 = vsyncpa [#allocation4 + $0x1], 1 }

// kernel: tpu_custom_call.1
= control target key start
LH: loop header
LB: loop body
LE: loop exit
PB: predicated region body
PF: predicated region fallthrough
CT: control target
= control target key end

     0   :  { %s2933_s0 = inlined_call_operand.hbm [shape: f32[8,16,16], index: 0, kind: input, shape index: {}]   ;;  %s2934_s1 = inlined_call_operand.hbm [shape: f32[8,16,16], index: 1, kind: input, shape index: {}]   ;;  %s2935_s2 = inlined_call_operand.hbm [shape: f32[16,16], index: 2, kind: input, shape index: {}]   ;;  %s2936_s3 = inlined_call_operand.hbm [shape: f32[16,16], index: 3, kind: input, shape index: {}]   ;;  %s2937_s4 = inlined_call_operand.hbm [shape: f32[2,1,4], index: 4, kind: output, shape index: {}]  }
   0x1   :  { %2942 = sst [smem:[#allocation16_spill]] %s2933_s0 }
   0x2   :  { %2943 = sst [smem:[#allocation17_spill]] %s2935_s2 }
   0x3   :  { %2944 = sst [smem:[#allocation18_spill]] %s2936_s3 }
   0x4   :  { %9 = vsyncpa [#allocation3], 0 }
   0x5   :  { %11 = vsyncpa [#allocation3 + $0x1], 0 }
   0x6   :  { %12 = vsyncpa [#allocation6], 0 }
   0x7   :  { %14 = vsyncpa [#allocation6 + $0x1], 0 }
   0x8   :  { %15 = vsyncpa [#allocation9], 0 }
   0x9   :  { %16 = vsyncpa [#allocation4], 0 }
   0xa   :  { %18 = vsyncpa [#allocation4 + $0x1], 0  ;;  %s2493_s15 = smov 0   ;;  %s2495_s16 = smov 0  }
   0xb   :  { %s2497_s17 = smov 0   ;;  %s2499_s18 = smov 0  }
   0xc LB: > { %s2514_s19 = sadd.s32 4294967295, %s2462_s18   ;;  %s2065_s20 = sadd.s32 4294967294, %s2462_s18   ;;  %s2462_s18 = sphi %s2499_s18, %s2959_s18   ;;  %s2458_s17 = sphi %s2497_s17, %s2958_s17   ;;  %s2454_s16 = sphi %s2495_s16, %s2957_s16   ;;  %s2450_s15 = sphi %s2493_s15, %s2956_s15  }
   0xd   : > { %p44_p0 = scmp.ne.s32.totalorder %s2454_s16, %s2450_s15  ;;  %p45_p1 = scmp.eq.s32.totalorder %s2514_s19, 0 }
   0xe   : > { %p136_p2 = scmp.eq.s32.totalorder %s2514_s19, 1  ;;  %p142_p3 = scmp.eq.s32.totalorder %s2065_s20, 1 }
   0xf   : > { %p2523_p4 = por %p45_p1, %p44_p0  ;;  %p2066_p5 = scmp.ge.s32.totalorder %s2462_s18, 1 }
  0x10   : > { %p2528_p6 = por %p142_p3, %p44_p0  ;;  %p149_p7 = scmp.lt.s32.totalorder %s2462_s18, 3 }
  0x11   : > { %s2947_s2 = sld [smem:[#allocation17_spill]]  ;;  %s2464_s27 = smov [#allocation7]  }
  0x12   : > { %p2536_p8 = pnand %p2066_p5, %p149_p7  ;;  %s162_s28 = sshll.u32 %s2464_s27, 4  ;;  %s163_s28 = int_to_ptr.vmem [resolvable:$true] %s162_s28 }
  0x13   : > { %s2949_s3 = sld [smem:[#allocation18_spill]]  ;;  %s2938_s6 = smov 128  }
  0x14   : > { %p2187_p9 = pneg %p2536_p8  ;;  %s2940_s7 = smov 8  }
  0x15   : > { %s2467_s8 = smov [#allocation8]   ;;  %s2555_s10 = sadd.s32 1, %s2462_s18  }
  0x16   : > { %p2188_p10 = pnand %p2187_p9, %p45_p1  ;;  %s176_s9 = sshll.u32 %s2467_s8, 4  ;;  %s177_s9 = int_to_ptr.vmem [resolvable:$true] %s176_s9 }
  0x17   : > { %s160_s25 = sshll.u32 %s2947_s2, 4  ;;  %s31_s11 = sadd.s32 1, %s2458_s17  ;;  %s161_s25 = int_to_ptr.hbm [resolvable:$true] %s160_s25 }
  0x18   : > { %2190 = dma.hbm_to_vmem [thread:$0]  (!%p2188_p10), %s161_s25, 256, %s163_s28, [#allocation6], %s2938_s6, %s2938_s6, %s2940_s7  }
  0x19   : > { %s174_s5 = sshll.u32 %s2949_s3, 4  ;;  %s28_s12 = ssub.s32 %s2462_s18, %s2555_s10  ;;  %s175_s5 = int_to_ptr.hbm [resolvable:$true] %s174_s5 }
  0x1a   : > { %2193 = dma.hbm_to_vmem [thread:$0]  (!%p2188_p10), %s175_s5, 256, %s177_s9, [#allocation9], %s2938_s6, %s2938_s6, %s2940_s7  }
  0x1b   : > { %p38_p12 = scmp.ne.s32.totalorder %s2458_s17, %s2454_s16  ;;  %p29_p13 = scmp.eq.s32.totalorder %s28_s12, 0 }
  0x1c   : > { %p39_p0 = scmp.eq.s32.totalorder %s2462_s18, 0  ;;  %p2207_p5 = scmp.lt.s32.totalorder %s2462_s18, 2 }
  0x1d   : > { %p2565_p3 = por %p136_p2, %p38_p12  ;;  %s190_s20 = sand.u32 1, %s2458_s17  }
  0x1e   : > { %s2571_s14 = scalar_select %p29_p13, %s2458_s17, %s31_s11  }
  0x1f   : > { %p40_p7 = por %p39_p0, %p38_p12  ;;  %s2574_s23 = sshll.u32 %s190_s20, 6 }
  0x20   : > { %s2166_s24 = sshll.u32 %s2462_s18, 6  ;;  %s2951_s0 = sld [smem:[#allocation16_spill]] }
  0x21   : > { %s194_s29 = scalar_lea.vmem [#allocation2], %s2574_s23  ;;  %p2581_p2 = pnand %p2207_p5, %p40_p7 }
  0x22   : > { %s203_s30 = sshll.u32 %s194_s29, 4  ;;  %s223_s12 = scalar_lea.hbm %s2934_s1, %s2166_s24  ;;  %s204_s30 = int_to_ptr.vmem [resolvable:$true] %s203_s30 }
  0x23   : > { %s224_s6 = sshll.u32 %s223_s12, 4  ;;  %s191_s7 = scalar_lea.sflag [#allocation3], %s190_s20  ;;  %s225_s6 = int_to_ptr.hbm [resolvable:$true] %s224_s6 }
  0x24   : > { %p2328_p10 = pneg %p2581_p2 }
  0x26   : > { %s200_s28 = scalar_lea.hbm %s2951_s0, %s2166_s24  ;;  %s2331_s29 = scalar_lea.hbm %s2951_s0, 128 }
  0x27   : > { %s201_s5 = sshll.u32 %s200_s28, 4  ;;  %s202_s5 = int_to_ptr.hbm [resolvable:$true] %s201_s5 }
  0x28   : > { %s2324_s2 = sshra.s32 %s202_s5, 4  ;;  %s2325_s2 = int_to_ptr.hbm [resolvable:$true] %s2324_s2 }
  0x29   : > { %s2326_s25 = scalar_lea.hbm %s2325_s2, 64  ;;  %p2332_p0 = scmp.lt.s32.totalorder %s2325_s2, %s2951_s0 }
  0x2a   : > { %p2327_p9 = scmp.ne.s32.totalorder %s2325_s2, %s2326_s25  ;;  %p2333_p5 = scmp.lt.s32.totalorder %s2331_s29, %s2326_s25 }
  0x2c   : > { %p2329_p12 = pnand %p2328_p10, %p2327_p9  ;;  %p2334_p7 = por %p2333_p5, %p2332_p0 }
  0x2e   : > { %p2330_p13 = pneg %p2329_p12 }
  0x30   : > { %p2335_p11 = pnand %p2334_p7, %p2330_p13 }
  0x32   : > { %2338 = shalt.err (!%p2335_p11)
}
  0x33   : > { %s2953_s20 = smov 8   ;;  %s2954_s24 = smov 128  }
  0x34   : > { %2197 = dma.hbm_to_vmem [thread:$0]  (!%p2581_p2), %s202_s5, 1024, %s204_s30, %s191_s7, %s2954_s24, %s2954_s24, %s2953_s20  }
  0x35   : > { %s217_s12 = scalar_lea.vmem [#allocation5], %s2574_s23  ;;  %s213_s28 = sand.u32 1, %s2462_s18  }
  0x36   : > { %s226_s27 = sshll.u32 %s217_s12, 4  ;;  %s214_s9 = scalar_lea.sflag [#allocation6], %s213_s28  ;;  %s227_s27 = int_to_ptr.vmem [resolvable:$true] %s226_s27 }
  0x37   : > { %s2354_s2 = sshra.s32 %s225_s6, 4  ;;  %s2361_s0 = scalar_lea.hbm %s2934_s1, 128  ;;  %s2355_s2 = int_to_ptr.hbm [resolvable:$true] %s2354_s2 }
  0x38   : > { %s2356_s25 = scalar_lea.hbm %s2355_s2, 64  ;;  %p2362_p13 = scmp.lt.s32.totalorder %s2355_s2, %s2934_s1 }
  0x39   : > { %p2357_p9 = scmp.ne.s32.totalorder %s2355_s2, %s2356_s25  ;;  %p2363_p0 = scmp.lt.s32.totalorder %s2361_s0, %s2356_s25 }
  0x3b   : > { %p2359_p11 = pnand %p2357_p9, %p2328_p10  ;;  %p2364_p5 = por %p2363_p0, %p2362_p13 }
  0x3d   : > { %p2360_p12 = pneg %p2359_p11 }
  0x3f   : > { %p2365_p7 = pnand %p2364_p5, %p2360_p12 }
  0x41   : > { %2368 = shalt.err (!%p2365_p7)
}
  0x42   : > { %2200 = dma.hbm_to_vmem [thread:$0]  (!%p2581_p2), %s225_s6, 1024, %s227_s27, %s214_s9, %s2954_s24, %s2954_s24, %s2953_s20  }
  0x43   : > { %238 = sbr.rel (%p2536_p8) target bundleno = 937 (0x3a9), region = 36  ;;  %s2623_s23 = sand.u32 (!%p2536_p8), 1, %s2454_s16  }
  0x44   : > { %s2079_s3 = sshll.u32 (!%p2536_p8), %s2623_s23, 6  ;;  %s241_s0 = scalar_lea.sflag (!%p2536_p8), [#allocation3], %s2623_s23 }
  0x45   : > { %s2627_s30 = scalar_lea.vmem (!%p2536_p8), [#allocation2], %s2079_s3 }
  0x48   : > { %2429 = dma.done.wait (%p2523_p4), %s241_s0, 1024  }
  0x49   : > { %2431 = vsyncadd (%p2523_p4), %s241_s0, 4294966272  ;;  %s250_s6 = sand.u32 1, %s2514_s19   ;;  %s2634_s5 = scalar_lea.vmem [#allocation5], %s2079_s3 }
  0x4a   : > { %s251_s26 = scalar_lea.sflag [#allocation6], %s250_s6 }
  0x4b   : > { %2433 = dma.done.wait (%p2523_p4), %s251_s26, 1024  }
  0x4c   : > { %2435 = vsyncadd (%p2523_p4), %s251_s26, 4294966272 }
  0x4d   : > { %2437 = dma.done.wait (%p45_p1), [#allocation6], 256  }
  0x4e   : > { %2439 = vsyncadd (%p45_p1), [#allocation6], 4294967040 }
  0x4f   : > { %2441 = dma.done.wait (%p45_p1), [#allocation9], 256  }
  0x50   : > { %2443 = vsyncadd (%p45_p1), [#allocation9], 4294967040  ;;  %v313_v0 = vld [vmem:[#allocation7 + $0x8] sm:$0xff]  ;;  %v312_v1 = vld [vmem:[#allocation7] sm:$0xff]  ;;  %vm316_vm0 = vcmask 130048   ;;  %s1953_s20 = scalar_lea.hbm %s2937_s4, %s2514_s19  ;;  %s293_s24 = scalar_lea.vmem [#allocation10], %s2623_s23 }
  0x51   : > { %2169 = vmatpush.msra.mxu2 %v313_v0  ;;  %v2649_v2 = vld [vmem:[%s2627_s30 + $0x20] sm:$0xff]  ;;  %355 = vmatpush.msra.mxu0 %v313_v0  ;;  %v2656_v4 = vld [vmem:[%s2627_s30 + $0x28] sm:$0xff]  ;;  %v2663_v6 = vld [vmem:[%s2627_s30 + $0x30] sm:$0xff]  ;;  %s1955_s12 = sshll.u32 %s293_s24, 4  ;;  %s1957_s27 = sshll.u32 %s1953_s20, 4  ;;  %s1956_s12 = int_to_ptr.vmem [resolvable:$true] %s1955_s12  ;;  %s1958_s27 = int_to_ptr.hbm [resolvable:$true] %s1957_s27 }
  0x52   : > { %v296_v3 = vld [vmem:[%s2627_s30] sm:$0xff]  ;;  %v297_v5 = vld [vmem:[%s2627_s30 + $0x8] sm:$0xff]  ;;  %v298_v7 = vld [vmem:[%s2627_s30 + $0x10] sm:$0xff]  ;;  %v837_v18 = vmul.f32 %v2649_v2, %v2649_v2  ;;  %v838_v20 = vmul.f32 %v2656_v4, %v2656_v4  ;;  %v839_v22 = vmul.f32 %v2663_v6, %v2663_v6  ;;  %s1945_s28 = scalar_lea.sflag [#allocation4], %s2623_s23  ;;  %s2398_s9 = sshra.s32 %s1958_s27, 4  ;;  %s2399_s9 = int_to_ptr.hbm [resolvable:$true] %s2398_s9 }
  0x53   : > { %2170 = vmatpush.msra.mxu2 %v312_v1  ;;  %356 = vmatpush.msra.mxu0 %v312_v1  ;;  %v2670_v8 = vld [vmem:[%s2627_s30 + $0x38] sm:$0xff]  ;;  %v833_v10 = vmul.f32 %v296_v3, %v296_v3  ;;  %v304_v11 = vld [vmem:[%s2634_s5] sm:$0xff]  ;;  %v834_v12 = vmul.f32 %v297_v5, %v297_v5  ;;  %v305_v13 = vld [vmem:[%s2634_s5 + $0x8] sm:$0xff]  ;;  %v835_v14 = vmul.f32 %v298_v7, %v298_v7  ;;  %s2400_s2 = scalar_lea.hbm %s2399_s9, 1  ;;  %s2404_s29 = scalar_lea.hbm %s2937_s4, 2 }
  0x54   : > { %2087 = vmatmul.msk.f32.vlgmr.msra.gmra.mxu2 %vm316_vm0, %v2649_v2  ;;  %2083 = vmatmul.msk.f32.vlgmr.msra.gmra.mxu0 %vm316_vm0, %v296_v3  ;;  %v299_v9 = vld [vmem:[%s2627_s30 + $0x18] sm:$0xff]  ;;  %v306_v15 = vld [vmem:[%s2634_s5 + $0x10] sm:$0xff]  ;;  %v308_v19 = vld [vmem:[%s2634_s5 + $0x20] sm:$0xff]  ;;  %v840_v24 = vmul.f32 %v2670_v8, %v2670_v8  ;;  %v1099_v26 = vmul.f32 %v304_v11, %v304_v11  ;;  %v1365_v27 = vmul.f32 %v304_v11, %v296_v3  ;;  %p2401_p1 = scmp.ne.s32.totalorder %s2399_s9, %s2400_s2  ;;  %p2405_p2 = scmp.lt.s32.totalorder %s2399_s9, %s2937_s4 }
  0x55   : > { %613 = vmatpush.msrb.mxu2 %v313_v0  ;;  %879 = vmatpush.msrb.mxu0 %v313_v0  ;;  %v836_v16 = vmul.f32 %v299_v9, %v299_v9  ;;  %v307_v17 = vld [vmem:[%s2634_s5 + $0x18] sm:$0xff]  ;;  %v309_v21 = vld [vmem:[%s2634_s5 + $0x28] sm:$0xff]  ;;  %v310_v23 = vld [vmem:[%s2634_s5 + $0x30] sm:$0xff]  ;;  %v1100_v28 = vmul.f32 %v305_v13, %v305_v13  ;;  %v1366_v29 = vmul.f32 %v305_v13, %v297_v5  ;;  %p2406_p10 = scmp.lt.s32.totalorder %s2404_s29, %s2400_s2 }
  0x56   : > { %v311_v25 = vld [vmem:[%s2634_s5 + $0x38] sm:$0xff]  ;;  %v1101_v30 = vmul.f32 %v306_v15, %v306_v15  ;;  %v1367_v31 = vmul.f32 %v306_v15, %v298_v7  ;;  %v1102_v32 = vmul.f32 %v307_v17, %v307_v17  ;;  %v1368_v33 = vmul.f32 %v307_v17, %v299_v9  ;;  %p2402_p4 = pnand %p2401_p1, %p2565_p3 }
  0x57   : > { %614 = vmatpush.msrb.mxu2 %v312_v1  ;;  %880 = vmatpush.msrb.mxu0 %v312_v1  ;;  %v1103_v34 = vmul.f32 %v308_v19, %v308_v19  ;;  %v1369_v35 = vmul.f32 %v308_v19, %v2649_v2  ;;  %v1104_v38 = vmul.f32 %v309_v21, %v309_v21  ;;  %p2407_p9 = por %p2406_p10, %p2405_p2 }
  0x58   : > { %v1370_v39 = vmul.f32 %v309_v21, %v2656_v4  ;;  %v1105_v42 = vmul.f32 %v310_v23, %v310_v23  ;;  %v1371_v43 = vmul.f32 %v310_v23, %v2663_v6  ;;  %v1106_v46 = vmul.f32 %v311_v25, %v311_v25  ;;  %p2403_p8 = pneg %p2402_p4 }
  0x59   : > { %1145 = vmatpush.msra.mxu2 %v313_v0  ;;  %1411 = vmatpush.msra.mxu0 %v313_v0  ;;  %v1372_v47 = vmul.f32 %v311_v25, %v2670_v8 }
  0x5a   : > { %p2408_p11 = pnand %p2407_p9, %p2403_p8 }
  0x5b   : > { %1146 = vmatpush.msra.mxu2 %v312_v1  ;;  %1412 = vmatpush.msra.mxu0 %v312_v1 }
  0x5c   : > { %2088 = vmatmul.msk.f32.gmra.mxu2 %vm316_vm0, %v2656_v4  ;;  %2084 = vmatmul.msk.f32.gmra.mxu0 %vm316_vm0, %v297_v5 }
  0x64   : > { %2089 = vmatmul.msk.f32.gmra.mxu2 %vm316_vm0, %v2663_v6  ;;  %2085 = vmatmul.msk.f32.gmra.mxu0 %vm316_vm0, %v298_v7 }
  0x6c   : > { %2090 = vmatmul.msk.f32.gmra.mxu2 %vm316_vm0, %v2670_v8  ;;  %2086 = vmatmul.msk.f32.gmra.mxu0 %vm316_vm0, %v299_v9 }
  0x74   : > { %2099 = vmatmul.msk.f32.vlgmr.msrb.gmra.mxu2 %vm316_vm0, %v304_v11  ;;  %2115 = vmatmul.msk.f32.vlgmr.msrb.gmra.mxu0 %vm316_vm0, %v833_v10  ;;  %v315_v10 = vld [vmem:[#allocation8 + $0x8] sm:$0xff]  ;;  %v314_v11 = vld [vmem:[#allocation8] sm:$0xff] }
  0x75   : > { %2171 = vmatpush.msra.mxu3 %v315_v10  ;;  %548 = vmatpush.msra.mxu1 %v315_v10 }
  0x77   : > { %2172 = vmatpush.msra.mxu3 %v314_v11  ;;  %549 = vmatpush.msra.mxu1 %v314_v11 }
  0x79   : > { %806 = vmatpush.msrb.mxu3 %v315_v10  ;;  %1072 = vmatpush.msrb.mxu1 %v315_v10 }
  0x7b   : > { %807 = vmatpush.msrb.mxu3 %v314_v11  ;;  %1073 = vmatpush.msrb.mxu1 %v314_v11 }
  0x7c   : > { %2100 = vmatmul.msk.f32.gmra.mxu2 %vm316_vm0, %v305_v13  ;;  %2116 = vmatmul.msk.f32.gmra.mxu0 %vm316_vm0, %v834_v12 }
  0x84   : > { %2101 = vmatmul.msk.f32.gmra.mxu2 %vm316_vm0, %v306_v15  ;;  %2117 = vmatmul.msk.f32.gmra.mxu0 %vm316_vm0, %v835_v14 }
  0x8c   : > { %2102 = vmatmul.msk.f32.gmra.mxu2 %vm316_vm0, %v307_v17  ;;  %2118 = vmatmul.msk.f32.gmra.mxu0 %vm316_vm0, %v836_v16 }
  0x94   : > { %2103 = vmatmul.msk.f32.gmra.mxu2 %vm316_vm0, %v308_v19  ;;  %2119 = vmatmul.msk.f32.gmra.mxu0 %vm316_vm0, %v837_v18 }
  0x9c   : > { %2104 = vmatmul.msk.f32.gmra.mxu2 %vm316_vm0, %v309_v21  ;;  %2120 = vmatmul.msk.f32.gmra.mxu0 %vm316_vm0, %v838_v20 }
  0xa4   : > { %2105 = vmatmul.msk.f32.gmra.mxu2 %vm316_vm0, %v310_v23  ;;  %2121 = vmatmul.msk.f32.gmra.mxu0 %vm316_vm0, %v839_v22 }
  0xac   : > { %2106 = vmatmul.msk.f32.gmra.mxu2 %vm316_vm0, %v311_v25  ;;  %2122 = vmatmul.msk.f32.gmra.mxu0 %vm316_vm0, %v840_v24 }
  0xb4   : > { %2131 = vmatmul.msk.f32.vlgmr.msra.gmra.mxu2 %vm316_vm0, %v1099_v26  ;;  %2147 = vmatmul.msk.f32.vlgmr.msra.gmra.mxu0 %vm316_vm0, %v1365_v27 }
  0xbc   : > { %2132 = vmatmul.msk.f32.gmra.mxu2 %vm316_vm0, %v1100_v28  ;;  %2148 = vmatmul.msk.f32.gmra.mxu0 %vm316_vm0, %v1366_v29 }
  0xc4   : > { %2133 = vmatmul.msk.f32.gmra.mxu2 %vm316_vm0, %v1101_v30  ;;  %2149 = vmatmul.msk.f32.gmra.mxu0 %vm316_vm0, %v1367_v31 }
  0xcc   : > { %2134 = vmatmul.msk.f32.gmra.mxu2 %vm316_vm0, %v1102_v32  ;;  %2150 = vmatmul.msk.f32.gmra.mxu0 %vm316_vm0, %v1368_v33 }
  0xd1   : > { %v358_v36 = vpop.f32.mrf.mxu0 }
  0xd2   : > { %382 = vxpose.xlu2.b32.start [1/2] (short) (narrow) %v358_v36, 16 }
  0xd4   : > { %2135 = vmatmul.msk.f32.gmra.mxu2 %vm316_vm0, %v1103_v34  ;;  %2151 = vmatmul.msk.f32.gmra.mxu0 %vm316_vm0, %v1369_v35 }
  0xd7   : > { %v370_v37 = vpop.f32.mrf.mxu2 }
  0xd8   : > { %446 = vxpose.xlu0.b32.start [1/2] (short) (narrow) %v370_v37, 16 }
  0xd9   : > { %v361_v40 = vpop.f32.mrf.mxu0 }
  0xda   : > { %383 = vxpose.xlu2.b32.end [2/2] (short) (narrow) %v361_v40, 16 }
  0xdc   : > { %2136 = vmatmul.msk.f32.gmra.mxu2 %vm316_vm0, %v1104_v38  ;;  %2152 = vmatmul.msk.f32.gmra.mxu0 %vm316_vm0, %v1370_v39 }
  0xdf   : > { %v373_v41 = vpop.f32.mrf.mxu2 }
  0xe0   : > { %447 = vxpose.xlu0.b32.end [2/2] (short) (narrow) %v373_v41, 16 }
  0xe1   : > { %v364_v44 = vpop.f32.mrf.mxu0 }
  0xe4   : > { %2137 = vmatmul.msk.f32.gmra.mxu2 %vm316_vm0, %v1105_v42  ;;  %2153 = vmatmul.msk.f32.gmra.mxu0 %vm316_vm0, %v1371_v43 }
  0xe7   : > { %v376_v45 = vpop.f32.mrf.mxu2 }
  0xe8   : > { %478 = vxpose.xlu1.b32.start [1/2] (short) (narrow) %v376_v45, 16 }
  0xe9   : > { %v367_v48 = vpop.f32.mrf.mxu0 }
  0xec   : > { %2138 = vmatmul.msk.f32.gmra.mxu2 %vm316_vm0, %v1106_v46  ;;  %2154 = vmatmul.msk.f32.gmra.mxu0 %vm316_vm0, %v1372_v47 }
  0xef   : > { %v379_v49 = vpop.f32.mrf.mxu2 }
  0xf0   : > { %479 = vxpose.xlu1.b32.end [2/2] (short) (narrow) %v379_v49, 16 }
  0xf1   : > { %v882_v50 = vpop.f32.mrf.mxu0 }
  0xf7   : > { %v616_v51 = vpop.f32.mrf.mxu2 }
  0xf8   : > { %640 = vxpose.xlu0.b32.start [1/2] (short) (narrow) %v616_v51, 16  ;;  %414 = vxpose.xlu1.b32.start [1/2] (short) (narrow) %v364_v44, 16 }
  0xf9   : > { %v885_v52 = vpop.f32.mrf.mxu0 }
  0xff   : > { %v619_v53 = vpop.f32.mrf.mxu2 }
 0x100   : > { %641 = vxpose.xlu0.b32.end [2/2] (short) (narrow) %v619_v53, 16  ;;  %415 = vxpose.xlu1.b32.end [2/2] (short) (narrow) %v367_v48, 16 }
 0x101   : > { %v888_v54 = vpop.f32.mrf.mxu0 }
 0x107   : > { %v622_v55 = vpop.f32.mrf.mxu2 }
 0x108   : > { %672 = vxpose.xlu2.b32.start [1/2] (short) (narrow) %v622_v55, 16  ;;  %906 = vxpose.xlu0.b32.start [1/2] (short) (narrow) %v882_v50, 16 }
 0x109   : > { %v891_v56 = vpop.f32.mrf.mxu0 }
 0x10f   : > { %v625_v57 = vpop.f32.mrf.mxu2 }
 0x110   : > { %673 = vxpose.xlu2.b32.end [2/2] (short) (narrow) %v625_v57, 16  ;;  %907 = vxpose.xlu0.b32.end [2/2] (short) (narrow) %v885_v52, 16 }
 0x111   : > { %v894_v58 = vpop.f32.mrf.mxu0 }
 0x117   : > { %v628_v59 = vpop.f32.mrf.mxu2 }
 0x118   : > { %704 = vxpose.xlu1.b32.start [1/2] (short) (narrow) %v628_v59, 16  ;;  %938 = vxpose.xlu2.b32.start [1/2] (short) (narrow) %v888_v54, 16 }
 0x119   : > { %v897_v60 = vpop.f32.mrf.mxu0 }
 0x11f   : > { %v631_v61 = vpop.f32.mrf.mxu2 }
 0x120   : > { %705 = vxpose.xlu1.b32.end [2/2] (short) (narrow) %v631_v61, 16  ;;  %939 = vxpose.xlu2.b32.end [2/2] (short) (narrow) %v891_v56, 16 }
 0x121   : > { %v900_v62 = vpop.f32.mrf.mxu0 }
 0x127   : > { %v634_v63 = vpop.f32.mrf.mxu2 }
 0x128   : > { %736 = vxpose.xlu0.b32.start [1/2] (short) (narrow) %v634_v63, 16  ;;  %970 = vxpose.xlu1.b32.start [1/2] (short) (narrow) %v894_v58, 16 }
 0x129   : > { %v903_v0 = vpop.f32.mrf.mxu0 }
 0x12f   : > { %v637_v1 = vpop.f32.mrf.mxu2 }
 0x130   : > { %737 = vxpose.xlu0.b32.end [2/2] (short) (narrow) %v637_v1, 16  ;;  %971 = vxpose.xlu1.b32.end [2/2] (short) (narrow) %v897_v60, 16 }
 0x131   : > { %v1414_v2 = vpop.f32.mrf.mxu0 }
 0x137   : > { %v1148_v3 = vpop.f32.mrf.mxu2 }
 0x138   : > { %1172 = vxpose.xlu2.b32.start [1/2] (short) (narrow) %v1148_v3, 16  ;;  %1002 = vxpose.xlu0.b32.start [1/2] (short) (narrow) %v900_v62, 16 }
 0x139   : > { %v1417_v4 = vpop.f32.mrf.mxu0 }
 0x13f   : > { %v1151_v5 = vpop.f32.mrf.mxu2 }
 0x140   : > { %1173 = vxpose.xlu2.b32.end [2/2] (short) (narrow) %v1151_v5, 16  ;;  %1003 = vxpose.xlu0.b32.end [2/2] (short) (narrow) %v903_v0, 16 }
 0x141   : > { %v1420_v6 = vpop.f32.mrf.mxu0 }
 0x147   : > { %v1154_v7 = vpop.f32.mrf.mxu2 }
 0x148   : > { %1204 = vxpose.xlu1.b32.start [1/2] (short) (narrow) %v1154_v7, 16  ;;  %1438 = vxpose.xlu2.b32.start [1/2] (short) (narrow) %v1414_v2, 16 }
 0x149   : > { %v1423_v8 = vpop.f32.mrf.mxu0 }
 0x14f   : > { %v1157_v9 = vpop.f32.mrf.mxu2 }
 0x150   : > { %1205 = vxpose.xlu1.b32.end [2/2] (short) (narrow) %v1157_v9, 16  ;;  %1439 = vxpose.xlu2.b32.end [2/2] (short) (narrow) %v1417_v4, 16 }
 0x151   : > { %v1426_v12 = vpop.f32.mrf.mxu0 }
 0x157   : > { %v1160_v13 = vpop.f32.mrf.mxu2 }
 0x158   : > { %1236 = vxpose.xlu0.b32.start [1/2] (short) (narrow) %v1160_v13, 16  ;;  %1470 = vxpose.xlu1.b32.start [1/2] (short) (narrow) %v1420_v6, 16 }
 0x159   : > { %v1429_v14 = vpop.f32.mrf.mxu0 }
 0x15f   : > { %v1163_v15 = vpop.f32.mrf.mxu2 }
 0x160   : > { %1237 = vxpose.xlu0.b32.end [2/2] (short) (narrow) %v1163_v15, 16  ;;  %1471 = vxpose.xlu1.b32.end [2/2] (short) (narrow) %v1423_v8, 16 }
 0x161   : > { %v1432_v16 = vpop.f32.mrf.mxu0 }
 0x167   : > { %v1166_v17 = vpop.f32.mrf.mxu2 }
 0x168   : > { %1502 = vxpose.xlu0.b32.start [1/2] (short) (narrow) %v1426_v12, 16  ;;  %1268 = vxpose.xlu2.b32.start [1/2] (short) (narrow) %v1166_v17, 16 }
 0x169   : > { %1534 = vxpose.xlu1.b32.start [1/2] (short) (narrow) %v1432_v16, 16  ;;  %v1435_v19 = vpop.f32.mrf.mxu0 }
 0x16b   : > { %v398_v18 = vpop.trf.xlu2 }
 0x16c   : > { %2091 = vmatmul.msk.f32.vlgmr.msra.gmra.mxu1 %vm316_vm0, %v398_v18 }
 0x16d   : > { %1604 = vmatpush.msra.mxu1 %v315_v10 }
 0x16f   : > { %v1169_v20 = vpop.f32.mrf.mxu2  ;;  %1605 = vmatpush.msra.mxu1 %v314_v11 }
 0x170   : > { %1503 = vxpose.xlu0.b32.end [2/2] (short) (narrow) %v1429_v14, 16  ;;  %1269 = vxpose.xlu2.b32.end [2/2] (short) (narrow) %v1169_v20, 16 }
 0x171   : > { %1535 = vxpose.xlu1.b32.end [2/2] (short) (narrow) %v1435_v19, 16 }
 0x173   : > { %v399_v21 = vpop.trf.xlu2 }
 0x174   : > { %2092 = vmatmul.msk.f32.gmra.mxu1 %vm316_vm0, %v399_v21 }
 0x17c   : > { %v462_v22 = vpop.trf.xlu0 }
 0x17d   : > { %2095 = vmatmul.msk.f32.vlgmr.msra.gmra.mxu3 %vm316_vm0, %v462_v22 }
 0x17e   : > { %1338 = vmatpush.msra.mxu3 %v315_v10 }
 0x180   : > { %1339 = vmatpush.msra.mxu3 %v314_v11 }
 0x184   : > { %v463_v23 = vpop.trf.xlu0 }
 0x185   : > { %2096 = vmatmul.msk.f32.gmra.mxu3 %vm316_vm0, %v463_v23 }
 0x18c   : > { %v494_v24 = vpop.trf.xlu1 }
 0x18d   : > { %2097 = vmatmul.msk.f32.gmra.mxu3 %vm316_vm0, %v494_v24 }
 0x194   : > { %v495_v25 = vpop.trf.xlu1 }
 0x195   : > { %2098 = vmatmul.msk.f32.gmra.mxu3 %vm316_vm0, %v495_v25 }
 0x19c   : > { %v656_v26 = vpop.trf.xlu0  ;;  %v430_v27 = vpop.trf.xlu1 }
 0x19d   : > { %2093 = vmatmul.msk.f32.gmra.mxu1 %vm316_vm0, %v430_v27  ;;  %2107 = vmatmul.msk.f32.vlgmr.msrb.gmra.mxu3 %vm316_vm0, %v656_v26 }
 0x1a1   : > { %v688_v28 = vpop.trf.xlu2 }
 0x1a4   : > { %v657_v29 = vpop.trf.xlu0  ;;  %v431_v30 = vpop.trf.xlu1 }
 0x1a5   : > { %2094 = vmatmul.msk.f32.gmra.mxu1 %vm316_vm0, %v431_v30  ;;  %2108 = vmatmul.msk.f32.gmra.mxu3 %vm316_vm0, %v657_v29 }
 0x1a9   : > { %v689_v32 = vpop.trf.xlu2 }
 0x1ac   : > { %v922_v31 = vpop.trf.xlu0 }
 0x1ad   : > { %2109 = vmatmul.msk.f32.gmra.mxu3 %vm316_vm0, %v688_v28  ;;  %2123 = vmatmul.msk.f32.vlgmr.msrb.gmra.mxu1 %vm316_vm0, %v922_v31 }
 0x1b1   : > { %v954_v34 = vpop.trf.xlu2 }
 0x1b4   : > { %v923_v33 = vpop.trf.xlu0 }
 0x1b5   : > { %2110 = vmatmul.msk.f32.gmra.mxu3 %vm316_vm0, %v689_v32  ;;  %2124 = vmatmul.msk.f32.gmra.mxu1 %vm316_vm0, %v923_v33 }
 0x1b9   : > { %v955_v36 = vpop.trf.xlu2 }
 0x1bc   : > { %v720_v35 = vpop.trf.xlu1 }
 0x1bd   : > { %2111 = vmatmul.msk.f32.gmra.mxu3 %vm316_vm0, %v720_v35  ;;  %2125 = vmatmul.msk.f32.gmra.mxu1 %vm316_vm0, %v954_v34 }
 0x1c4   : > { %v721_v37 = vpop.trf.xlu1 }
 0x1c5   : > { %2112 = vmatmul.msk.f32.gmra.mxu3 %vm316_vm0, %v721_v37  ;;  %2126 = vmatmul.msk.f32.gmra.mxu1 %vm316_vm0, %v955_v36 }
 0x1cc   : > { %v752_v38 = vpop.trf.xlu0  ;;  %v986_v39 = vpop.trf.xlu1 }
 0x1cd   : > { %2113 = vmatmul.msk.f32.gmra.mxu3 %vm316_vm0, %v752_v38  ;;  %2127 = vmatmul.msk.f32.gmra.mxu1 %vm316_vm0, %v986_v39 }
 0x1d1   : > { %v1188_v40 = vpop.trf.xlu2 }
 0x1d4   : > { %v753_v41 = vpop.trf.xlu0  ;;  %v987_v42 = vpop.trf.xlu1 }
 0x1d5   : > { %2114 = vmatmul.msk.f32.gmra.mxu3 %vm316_vm0, %v753_v41  ;;  %2128 = vmatmul.msk.f32.gmra.mxu1 %vm316_vm0, %v987_v42 }
 0x1d9   : > { %v1189_v44 = vpop.trf.xlu2 }
 0x1dc   : > { %v1018_v43 = vpop.trf.xlu0 }
 0x1dd   : > { %2129 = vmatmul.msk.f32.gmra.mxu1 %vm316_vm0, %v1018_v43  ;;  %2139 = vmatmul.msk.f32.vlgmr.msra.gmra.mxu3 %vm316_vm0, %v1188_v40 }
 0x1e1   : > { %v1454_v46 = vpop.trf.xlu2 }
 0x1e4   : > { %v1019_v45 = vpop.trf.xlu0 }
 0x1e5   : > { %2130 = vmatmul.msk.f32.gmra.mxu1 %vm316_vm0, %v1019_v45  ;;  %2140 = vmatmul.msk.f32.gmra.mxu3 %vm316_vm0, %v1189_v44 }
 0x1e9   : > { %v1455_v48 = vpop.trf.xlu2  ;;  %v551_v55 = vpop.f32.mrf.mxu1 }
 0x1ea   : > { %v1631_v28 = vmul.f32 %v551_v55, %v551_v55 }
 0x1ec   : > { %v1220_v47 = vpop.trf.xlu1 }
 0x1ed   : > { %2141 = vmatmul.msk.f32.gmra.mxu3 %vm316_vm0, %v1220_v47  ;;  %2155 = vmatmul.msk.f32.vlgmr.msra.gmra.mxu1 %vm316_vm0, %v1454_v46 }
 0x1f1   : > { %v554_v60 = vpop.f32.mrf.mxu1 }
 0x1f2   : > { %v1632_v38 = vmul.f32 %v554_v60, %v554_v60 }
 0x1f4   : > { %v1221_v49 = vpop.trf.xlu1 }
 0x1f5   : > { %2142 = vmatmul.msk.f32.gmra.mxu3 %vm316_vm0, %v1221_v49  ;;  %2156 = vmatmul.msk.f32.gmra.mxu1 %vm316_vm0, %v1455_v48 }
 0x1fc   : > { %v1252_v50 = vpop.trf.xlu0  ;;  %v1486_v51 = vpop.trf.xlu1 }
 0x1fd   : > { %2143 = vmatmul.msk.f32.gmra.mxu3 %vm316_vm0, %v1252_v50  ;;  %2157 = vmatmul.msk.f32.gmra.mxu1 %vm316_vm0, %v1486_v51 }
 0x200   : > { %v2760_v52 = vpop.f32.mrf.mxu3 }
 0x201   : > { %v1284_v57 = vpop.trf.xlu2 }
 0x204   : > { %v1253_v53 = vpop.trf.xlu0  ;;  %v1487_v54 = vpop.trf.xlu1 }
 0x205   : > { %2144 = vmatmul.msk.f32.gmra.mxu3 %vm316_vm0, %v1253_v53  ;;  %2158 = vmatmul.msk.f32.gmra.mxu1 %vm316_vm0, %v1487_v54 }
 0x208   : > { %v2764_v56 = vpop.f32.mrf.mxu3 }
 0x209   : > { %v1285_v61 = vpop.trf.xlu2 }
 0x20c   : > { %v1518_v58 = vpop.trf.xlu0 }
 0x20d   : > { %2145 = vmatmul.msk.f32.gmra.mxu3 %vm316_vm0, %v1284_v57  ;;  %2159 = vmatmul.msk.f32.gmra.mxu1 %vm316_vm0, %v1518_v58  ;;  %v1550_v0 = vpop.trf.xlu1 }
 0x210   : > { %v2768_v59 = vpop.f32.mrf.mxu3 }
 0x214   : > { %v1519_v62 = vpop.trf.xlu0 }
 0x215   : > { %2146 = vmatmul.msk.f32.gmra.mxu3 %vm316_vm0, %v1285_v61  ;;  %2160 = vmatmul.msk.f32.gmra.mxu1 %vm316_vm0, %v1519_v62  ;;  %v1551_v5 = vpop.trf.xlu1 }
 0x218   : > { %v2772_v63 = vpop.f32.mrf.mxu3 }
 0x21a   : > { %v557_v1 = vpop.f32.mrf.mxu1 }
 0x21b   : > { %v1633_v51 = vmul.f32 %v557_v1, %v557_v1 }
 0x21d   : > { %2161 = vmatmul.msk.f32.gmra.mxu1 %vm316_vm0, %v1550_v0 }
 0x220   : > { %v809_v2 = vpop.f32.mrf.mxu3 }
 0x221   : > { %v1647_v3 = vmul.f32 %v809_v2, %v551_v55  ;;  %v1639_v27 = vmul.f32 %v809_v2, %v809_v2 }
 0x222   : > { %v2775_v4 = vpop.f32.mrf.mxu1 }
 0x223   : > { %v1703_v30 = vadd.f32 %v1639_v27, %v1631_v28  ;;  %v1655_v62 = vmul.f32 2.0, %v1647_v3 }
 0x225   : > { %2162 = vmatmul.msk.f32.gmra.mxu1 %vm316_vm0, %v1551_v5  ;;  %v1711_v35 = vadd.f32 0.0001, %v1703_v30  ;;  %v1663_v30 = vadd.f32 0.0001, %v1655_v62 }
 0x228   : > { %v812_v6 = vpop.f32.mrf.mxu3 }
 0x229   : > { %v2778_v7 = vmul.f32 %v812_v6, %v554_v60  ;;  %v1640_v36 = vmul.f32 %v812_v6, %v812_v6 }
 0x22a   : > { %v1075_v8 = vpop.f32.mrf.mxu1 }
 0x22b   : > { %v1719_v31 = vsub.f32 %v1075_v8, %v1631_v28  ;;  %v1704_v41 = vadd.f32 %v1640_v36, %v1632_v38  ;;  %v1634_v28 = vmul.f32 %v2775_v4, %v2775_v4 }
 0x22d   : > { %v1712_v47 = vadd.f32 0.0001, %v1704_v41 }
 0x230   : > { %v815_v9 = vpop.f32.mrf.mxu3 }
 0x231   : > { %v2780_v10 = vmul.f32 %v815_v9, %v557_v1  ;;  %v1641_v48 = vmul.f32 %v815_v9, %v815_v9 }
 0x232   : > { %v1078_v11 = vpop.f32.mrf.mxu1 }
 0x233   : > { %v1720_v42 = vsub.f32 %v1078_v11, %v1632_v38  ;;  %v1705_v58 = vadd.f32 %v1641_v48, %v1633_v51 }
 0x238   : > { %v818_v12 = vpop.f32.mrf.mxu3 }
 0x239   : > { %v2783_v13 = vmul.f32 %v818_v12, %v2775_v4  ;;  %v1642_v5 = vmul.f32 %v818_v12, %v818_v12 }
 0x23a   : > { %v1081_v14 = vpop.f32.mrf.mxu1 }
 0x23b   : > { %v1721_v60 = vsub.f32 %v1081_v14, %v1633_v51 }
 0x240   : > { %v2785_v15 = vpop.f32.mrf.mxu3 }
 0x241   : > { %v2789_v16 = vmul.f32 %v2785_v15, %v2760_v52 }
 0x242   : > { %v2791_v17 = vpop.f32.mrf.mxu1 }
 0x243   : > { %v1722_v4 = vsub.f32 %v2791_v17, %v1634_v28 }
 0x248   : > { %v2793_v18 = vpop.f32.mrf.mxu3 }
 0x249   : > { %v2797_v19 = vmul.f32 %v2793_v18, %v2764_v56 }
 0x24a   : > { %v2799_v20 = vpop.f32.mrf.mxu1 }
 0x250   : > { %v2801_v21 = vpop.f32.mrf.mxu3 }
 0x251   : > { %v2805_v22 = vmul.f32 %v2801_v21, %v2768_v59 }
 0x252   : > { %v2807_v23 = vpop.f32.mrf.mxu1 }
 0x258   : > { %v2809_v24 = vpop.f32.mrf.mxu3 }
 0x259   : > { %v2813_v25 = vmul.f32 %v2809_v24, %v2772_v63 }
 0x25a   : > { %v2815_v26 = vpop.f32.mrf.mxu1 }
 0x260   : > { %v1341_v29 = vpop.f32.mrf.mxu3 }
 0x261   : > { %v1727_v32 = vsub.f32 %v1341_v29, %v1639_v27  ;;  %v1713_v29 = vadd.f32 0.0001, %v1705_v58 }
 0x262   : > { %v2817_v33 = vpop.f32.mrf.mxu1 }
 0x263   : > { %v1735_v34 = vadd.f32 %v1727_v32, %v1719_v31  ;;  %v1706_v32 = vadd.f32 %v1642_v5, %v1634_v28 }
 0x265   : > { %v1743_v37 = vadd.f32 0.0009, %v1735_v34 }
 0x267   : > { %v1751_v39 = vmul.f32 %v1743_v37, %v1711_v35 }
 0x268   : > { %v1344_v40 = vpop.f32.mrf.mxu3 }
 0x269   : > { %2248 = vrcp.f32 %v1751_v39  ;;  %v1728_v43 = vsub.f32 %v1344_v40, %v1640_v36  ;;  %v1768_v8 = vand.u32 2147483647, %v1751_v39  ;;  %v1770_v9 = vand.u32 2147483648, %v1751_v39 }
 0x26a   : > { %v1607_v44 = vpop.f32.mrf.mxu1  ;;  %vm1764_vm2 = vweird.f32 %v1751_v39 }
 0x26b   : > { %v1736_v45 = vadd.f32 %v1728_v43, %v1720_v42  ;;  %v1671_v46 = vsub.f32 %v1607_v44, %v1647_v3  ;;  %vm1769_vm4 = vcmp.eq.f32.partialorder %v1768_v8, 8.507059e+37  ;;  %v1771_v12 = vor.u32 1.1754944e-38, %v1770_v9 }
 0x26c   : > { %v1643_v43 = vmul.f32 %v2785_v15, %v2785_v15 }
 0x26d   : > { %v1744_v49 = vadd.f32 0.0009, %v1736_v45  ;;  %v1679_v54 = vmul.f32 2.0, %v1671_v46 }
 0x26f   : > { %v2249_v50 = vpop.eup %2248  ;;  %v2819_v53 = vmul.f32 %v1744_v49, %v1712_v47  ;;  %v1687_v11 = vadd.f32 0.0009, %v1679_v54 }
 0x270   : > { %v1347_v55 = vpop.f32.mrf.mxu3  ;;  %v1760_v57 = vmul.f32 %v2249_v50, %v1751_v39  ;;  %vm1765_vm1 = vweird.f32 %v2249_v50  ;;  %v1656_v39 = vmul.f32 2.0, %v2778_v7 }
 0x271   : > { %2250 = vrcp.f32 %v2819_v53  ;;  %v1729_v61 = vsub.f32 %v1347_v55, %v1641_v48  ;;  %vm1766_vm3 = vmor %vm1764_vm2, %vm1765_vm1  ;;  %v1695_v35 = vmul.f32 %v1687_v11, %v1663_v30  ;;  %v1783_v49 = vand.u32 2147483647, %v2819_v53 }
 0x272   : > { %v1610_v0 = vpop.f32.mrf.mxu1  ;;  %v1761_v2 = vsub.f32 1.0, %v1760_v57  ;;  %v1714_v55 = vadd.f32 0.0001, %v1706_v32  ;;  %v1664_v57 = vadd.f32 0.0001, %v1656_v39  ;;  %vm1779_vm6 = vweird.f32 %v2819_v53 }
 0x273   : > { %v1737_v6 = vadd.f32 %v1729_v61, %v1721_v60  ;;  %v1672_v1 = vsub.f32 %v1610_v0, %v2778_v7  ;;  %v1635_v7 = vmul.f32 %v2760_v52, %v2760_v52  ;;  %vm1784_vm8 = vcmp.eq.f32.partialorder %v1783_v49, 8.507059e+37 }
 0x274   : > { %v1762_v27 = vmul.f32 %v2249_v50, %v1761_v2  ;;  %v1645_v49 = vmul.f32 %v2801_v21, %v2801_v21 }
 0x275   : > { %v1745_v14 = vadd.f32 0.0009, %v1737_v6  ;;  %v1680_v36 = vmul.f32 2.0, %v1672_v1  ;;  %v1707_v61 = vadd.f32 %v1643_v43, %v1635_v7  ;;  %v1723_v9 = vsub.f32 %v2799_v20, %v1635_v7 }
 0x276   : > { %v1763_v31 = vadd.f32 %v2249_v50, %v1762_v27  ;;  %v1644_v27 = vmul.f32 %v2793_v18, %v2793_v18 }
 0x277   : > { %v2251_v3 = vpop.eup %2250  ;;  %v2825_v34 = vmul.f32 %v1745_v14, %v1713_v29  ;;  %v1688_v17 = vadd.f32 0.0009, %v1680_v36  ;;  %v1715_v36 = vadd.f32 0.0001, %v1707_v61 }
 0x278   : > { %v1350_v37 = vpop.f32.mrf.mxu3  ;;  %v1767_v38 = vsel %vm1766_vm3, %v2249_v50, %v1763_v31  ;;  %v1775_v40 = vmul.f32 %v2251_v3, %v2819_v53  ;;  %v1785_v50 = vand.u32 2147483648, %v2819_v53  ;;  %vm1780_vm5 = vweird.f32 %v2251_v3 }
 0x279   : > { %2252 = vrcp.f32 %v2825_v34  ;;  %v1730_v41 = vsub.f32 %v1350_v37, %v1642_v5  ;;  %v1772_v42 = vsel %vm1769_vm4, %v1771_v12, %v1767_v38  ;;  %vm1781_vm7 = vmor %vm1779_vm6, %vm1780_vm5  ;;  %v1696_v5 = vmul.f32 %v1688_v17, %v1664_v57 }
 0x27a   : > { %v1613_v44 = vpop.f32.mrf.mxu1  ;;  %v1773_v45 = vmul.f32 %v1772_v42, %v1695_v35  ;;  %v1776_v46 = vsub.f32 1.0, %v1775_v40  ;;  %v1786_v2 = vor.u32 1.1754944e-38, %v1785_v50  ;;  %v1657_v53 = vmul.f32 2.0, %v2780_v10 }
 0x27b   : > { %v1738_v47 = vadd.f32 %v1730_v41, %v1722_v4  ;;  %v1673_v48 = vsub.f32 %v1613_v44, %v2780_v10  ;;  %v1800_v32 = vand.u32 2147483648, %v2825_v34  ;;  %v1636_v10 = vmul.f32 %v2764_v56, %v2764_v56 }
 0x27c   : > { %v1879_v51 = vsel %vm316_vm0, %v1773_v45, 0.0  ;;  %v1777_v54 = vmul.f32 %v2251_v3, %v1776_v46  ;;  %v1665_v37 = vadd.f32 0.0001, %v1657_v53  ;;  %vm1794_vm10 = vweird.f32 %v2825_v34 }
 0x27d   : > { %v1746_v15 = vadd.f32 0.0009, %v1738_v47  ;;  %1880 = vadd.xlane.f32.xlu2 %v1879_v51  ;;  %v1681_v0 = vmul.f32 2.0, %v1673_v48  ;;  %v1708_v4 = vadd.f32 %v1644_v27, %v1636_v10  ;;  %v1801_v42 = vor.u32 1.1754944e-38, %v1800_v32 }
 0x27e   : > { %v1778_v58 = vadd.f32 %v2251_v3, %v1777_v54  ;;  %v1724_v46 = vsub.f32 %v2807_v23, %v1636_v10 }
 0x27f   : > { %v2253_v60 = vpop.eup %2252  ;;  %v2840_v62 = vmul.f32 %v1746_v15, %v1714_v55  ;;  %v1689_v30 = vadd.f32 0.0009, %v1681_v0 }
 0x280   : > { %v1353_v6 = vpop.f32.mrf.mxu3  ;;  %v1782_v8 = vsel %vm1781_vm7, %v2251_v3, %v1778_v58  ;;  %v1790_v52 = vmul.f32 %v2253_v60, %v2825_v34  ;;  %v1798_v3 = vand.u32 2147483647, %v2825_v34  ;;  %vm1795_vm9 = vweird.f32 %v2253_v60 }
 0x281   : > { %2254 = vrcp.f32 %v2840_v62  ;;  %v1731_v11 = vsub.f32 %v1353_v6, %v1643_v43  ;;  %v1787_v1 = vsel %vm1784_vm8, %v1786_v2, %v1782_v8  ;;  %vm1796_vm11 = vmor %vm1794_vm10, %vm1795_vm9  ;;  %v1697_v39 = vmul.f32 %v1689_v30, %v1665_v37 }
 0x282   : > { %v1616_v28 = vpop.f32.mrf.mxu1  ;;  %v1788_v29 = vmul.f32 %v1787_v1, %v1696_v5  ;;  %v1791_v14 = vsub.f32 1.0, %v1790_v52  ;;  %vm1799_vm12 = vcmp.eq.f32.partialorder %v1798_v3, 8.507059e+37  ;;  %v1658_v34 = vmul.f32 2.0, %v2783_v13 }
 0x283   : > { %v1739_v31 = vadd.f32 %v1731_v11, %v1723_v9  ;;  %v1674_v20 = vsub.f32 %v1616_v28, %v2783_v13  ;;  %v1813_v55 = vand.u32 2147483647, %v2840_v62  ;;  %v1815_v15 = vand.u32 2147483648, %v2840_v62 }
 0x284   : > { %v1882_v12 = vsel %vm316_vm0, %v1788_v29, 0.0  ;;  %v1792_v35 = vmul.f32 %v2253_v60, %v1791_v14  ;;  %v1637_v13 = vmul.f32 %v2768_v59, %v2768_v59  ;;  %v1666_v61 = vadd.f32 0.0001, %v1658_v34 }
 0x285   : > { %v1747_v18 = vadd.f32 0.0009, %v1739_v31  ;;  %1883 = vadd.xlane.f32.xlu0 %v1882_v12  ;;  %v1682_v43 = vmul.f32 2.0, %v1674_v20  ;;  %vm1809_vm14 = vweird.f32 %v2840_v62  ;;  %v1816_v52 = vor.u32 1.1754944e-38, %v1815_v15 }
 0x286   : > { %v1793_v38 = vadd.f32 %v2253_v60, %v1792_v35  ;;  %v1709_v5 = vadd.f32 %v1645_v49, %v1637_v13  ;;  %vm1814_vm1 = vcmp.eq.f32.partialorder %v1813_v55, 8.507059e+37  ;;  %v1725_v53 = vsub.f32 %v2815_v26, %v1637_v13 }
 0x287   : > { %v2255_v40 = vpop.eup %2254  ;;  %v2855_v41 = vmul.f32 %v1747_v18, %v1715_v36  ;;  %v1690_v23 = vadd.f32 0.0009, %v1682_v43  ;;  %v1646_v29 = vmul.f32 %v2809_v24, %v2809_v24 }
 0x288   : > { %v1356_v44 = vpop.f32.mrf.mxu3  ;;  %v1797_v45 = vsel %vm1796_vm11, %v2253_v60, %v1793_v38  ;;  %v1805_v56 = vmul.f32 %v2255_v40, %v2840_v62  ;;  %vm1810_vm13 = vweird.f32 %v2255_v40  ;;  %v1716_v60 = vadd.f32 0.0001, %v1708_v4 }
 0x289   : > { %2256 = vrcp.f32 %v2855_v41  ;;  %v1732_v47 = vsub.f32 %v1356_v44, %v1644_v27  ;;  %v1802_v48 = vsel %vm1799_vm12, %v1801_v42, %v1797_v45  ;;  %vm1811_vm15 = vmor %vm1809_vm14, %vm1810_vm13  ;;  %v1698_v9 = vmul.f32 %v1690_v23, %v1666_v61 }
 0x28a   : > { %v1619_v50 = vpop.f32.mrf.mxu1  ;;  %v1803_v17 = vmul.f32 %v1802_v48, %v1697_v39  ;;  %v1806_v51 = vsub.f32 1.0, %v1805_v56  ;;  %v1659_v62 = vmul.f32 2.0, %v2789_v16  ;;  %v1828_v20 = vand.u32 2147483647, %v2855_v41 }
 0x28b   : > { %v1740_v54 = vadd.f32 %v1732_v47, %v1724_v46  ;;  %v1675_v7 = vsub.f32 %v1619_v50, %v2789_v16  ;;  %v1830_v12 = vand.u32 2147483648, %v2855_v41  ;;  %v1638_v16 = vmul.f32 %v2772_v63, %v2772_v63 }
 0x28c   : > { %v1885_v57 = vsel %vm316_vm0, %v1803_v17, 0.0  ;;  %v1807_v58 = vmul.f32 %v2255_v40, %v1806_v51  ;;  %v1717_v36 = vadd.f32 0.0001, %v1709_v5  ;;  %v1667_v18 = vadd.f32 0.0001, %v1659_v62 }
 0x28d   : > { %v1748_v21 = vadd.f32 0.0009, %v1740_v54  ;;  %1886 = vadd.xlane.f32.xlu1 %v1885_v57  ;;  %v1683_v8 = vmul.f32 2.0, %v1675_v7  ;;  %vm1824_vm3 = vweird.f32 %v2855_v41  ;;  %vm1829_vm5 = vcmp.eq.f32.partialorder %v1828_v20, 8.507059e+37 }
 0x28e   : > { %v1808_v0 = vadd.f32 %v2255_v40, %v1807_v58  ;;  %v1831_v42 = vor.u32 1.1754944e-38, %v1830_v12  ;;  %v1726_v63 = vsub.f32 %v2817_v33, %v1638_v16  ;;  %v1660_v48 = vmul.f32 2.0, %v2797_v19 }
 0x28f   : > { %v2257_v2 = vpop.eup %2256  ;;  %v2870_v6 = vmul.f32 %v1748_v21, %v1716_v60  ;;  %v1691_v3 = vadd.f32 0.0009, %v1683_v8  ;;  %v1661_v8 = vmul.f32 2.0, %v2805_v22  ;;  %v1662_v12 = vmul.f32 2.0, %v2813_v25 }
 0x290   : > { %v1359_v11 = vpop.f32.mrf.mxu3  ;;  %v1812_v1 = vsel %vm1811_vm15, %v2255_v40, %v1808_v0  ;;  %v1820_v59 = vmul.f32 %v2257_v2, %v2855_v41  ;;  %vm1825_vm2 = vweird.f32 %v2257_v2  ;;  %v1710_v40 = vadd.f32 %v1646_v29, %v1638_v16 }
 0x291   : > { %2258 = vrcp.f32 %v2870_v6  ;;  %v1733_v27 = vsub.f32 %v1359_v11, %v1645_v49  ;;  %v1817_v28 = vsel %vm1814_vm1, %v1816_v52, %v1812_v1  ;;  %vm1826_vm4 = vmor %vm1824_vm3, %vm1825_vm2  ;;  %v1699_v39 = vmul.f32 %v1691_v3, %v1667_v18 }
 0x292   : > { %v1622_v14 = vpop.f32.mrf.mxu1  ;;  %v1818_v30 = vmul.f32 %v1817_v28, %v1698_v9  ;;  %v1821_v31 = vsub.f32 1.0, %v1820_v59  ;;  %v1843_v51 = vand.u32 2147483647, %v2870_v6  ;;  %v1845_v54 = vand.u32 2147483648, %v2870_v6 }
 0x293   : > { %v1741_v32 = vadd.f32 %v1733_v27, %v1725_v53  ;;  %v1676_v26 = vsub.f32 %v1622_v14, %v2797_v19  ;;  %v1718_v33 = vadd.f32 0.0001, %v1710_v40  ;;  %v1668_v57 = vadd.f32 0.0001, %v1660_v48 }
 0x294   : > { %v1888_v35 = vsel %vm316_vm0, %v1818_v30, 0.0  ;;  %v1822_v10 = vmul.f32 %v2257_v2, %v1821_v31  ;;  %vm1839_vm7 = vweird.f32 %v2870_v6  ;;  %v1846_v21 = vor.u32 1.1754944e-38, %v1845_v54 }
 0x295   : > { %v1749_v24 = vadd.f32 0.0009, %v1741_v32  ;;  %1889 = vadd.xlane.f32.xlu1 %v1888_v35  ;;  %v1684_v43 = vmul.f32 2.0, %v1676_v26  ;;  %vm1844_vm9 = vcmp.eq.f32.partialorder %v1843_v51, 8.507059e+37  ;;  %v1669_v62 = vadd.f32 0.0001, %v1661_v8 }
 0x296   : > { %v1823_v37 = vadd.f32 %v2257_v2, %v1822_v10  ;;  %vm1916_vm3 = vcmask 130112  }
 0x297   : > { %v2259_v38 = vpop.eup %2258  ;;  %v1757_v4 = vmul.f32 %v1749_v24, %v1717_v36  ;;  %v1692_v7 = vadd.f32 0.0009, %v1684_v43 }
 0x298   : > { %v1362_v44 = vpop.f32.mrf.mxu3  ;;  %v1827_v45 = vsel %vm1826_vm4, %v2257_v2, %v1823_v37  ;;  %v1835_v56 = vmul.f32 %v2259_v38, %v2870_v6  ;;  %vm1840_vm6 = vweird.f32 %v2259_v38  ;;  %v1670_v37 = vadd.f32 0.0001, %v1662_v12 }
 0x299   : > { %2260 = vrcp.f32 %v1757_v4  ;;  %v1734_v46 = vsub.f32 %v1362_v44, %v1646_v29  ;;  %v1832_v47 = vsel %vm1829_vm5, %v1831_v42, %v1827_v45  ;;  %vm1841_vm8 = vmor %vm1839_vm7, %vm1840_vm6  ;;  %v1700_v61 = vmul.f32 %v1692_v7, %v1668_v57 }
 0x29a   : > { %v1625_v41 = vpop.f32.mrf.mxu1  ;;  %v1833_v34 = vmul.f32 %v1832_v47, %v1699_v39  ;;  %v1836_v49 = vsub.f32 1.0, %v1835_v56  ;;  %v1858_v59 = vand.u32 2147483647, %v1757_v4  ;;  %v1860_v53 = vand.u32 2147483648, %v1757_v4 }
 0x29b   : > { %v1742_v50 = vadd.f32 %v1734_v46, %v1726_v63  ;;  %v1677_v17 = vsub.f32 %v1625_v41, %v2805_v22  ;;  %vm1854_vm11 = vweird.f32 %v1757_v4  ;;  %v1911_v63 = vlaneseq }
 0x29c   : > { %v1891_v55 = vsel %vm316_vm0, %v1833_v34, 0.0  ;;  %v1837_v15 = vmul.f32 %v2259_v38, %v1836_v49  ;;  %vm1859_vm13 = vcmp.eq.f32.partialorder %v1858_v59, 8.507059e+37  ;;  %v1861_v22 = vor.u32 1.1754944e-38, %v1860_v53 }
 0x29d   : > { %v1750_v23 = vadd.f32 0.0009, %v1742_v50  ;;  %1892 = vadd.xlane.f32.xlu2 %v1891_v55  ;;  %v1685_v60 = vmul.f32 2.0, %v1677_v17  ;;  %v1912_v47 = vand.u32 127, %v1911_v63  ;;  %vm1929_vm4 = vcmask 1042434  }
 0x29e   : > { %v1838_v19 = vadd.f32 %v2259_v38, %v1837_v15  ;;  %vm1931_vm5 = vcmask 1043459   ;;  %vm1934_vm6 = vcmask 125952   ;;  %vm1942_vm7 = vcmask 24576  }
 0x29f   : > { %v2261_v58 = vpop.eup %2260  ;;  %v1758_v13 = vmul.f32 %v1750_v23, %v1718_v33  ;;  %v1693_v1 = vadd.f32 0.0009, %v1685_v60  ;;  %v1914_v41 = vadd.s32 4294967288, %v1912_v47 }
 0x2a0   : > { %v1842_v0 = vsel %vm1841_vm8, %v2259_v38, %v1838_v19  ;;  %v1850_v2 = vmul.f32 %v2261_v58, %v1757_v4  ;;  %vm1855_vm10 = vweird.f32 %v2261_v58 }
 0x2a1   : > { %2262 = vrcp.f32 %v1758_v13  ;;  %v1847_v5 = vsel %vm1844_vm9, %v1846_v21, %v1842_v0  ;;  %vm1856_vm12 = vmor %vm1854_vm11, %vm1855_vm10  ;;  %v1701_v30 = vmul.f32 %v1693_v1, %v1669_v62  ;;  %v1873_v10 = vand.u32 2147483647, %v1758_v13 }
 0x2a2   : > { %v1628_v52 = vpop.f32.mrf.mxu1  ;;  %v1848_v9 = vmul.f32 %v1847_v5, %v1700_v61  ;;  %v1851_v11 = vsub.f32 1.0, %v1850_v2  ;;  %v1875_v16 = vand.u32 2147483648, %v1758_v13  ;;  %vm1869_vm15 = vweird.f32 %v1758_v13 }
 0x2a3   : > { %v1678_v6 = vsub.f32 %v1628_v52, %v2813_v25  ;;  %vm1874_vm2 = vcmp.eq.f32.partialorder %v1873_v10, 8.507059e+37 }
 0x2a4   : > { %v1894_v27 = vsel %vm316_vm0, %v1848_v9, 0.0  ;;  %v1852_v28 = vmul.f32 %v2261_v58, %v1851_v11  ;;  %v1876_v40 = vor.u32 1.1754944e-38, %v1875_v16 }
 0x2a5   : > { %1895 = vadd.xlane.f32.xlu1 %v1894_v27  ;;  %v1686_v31 = vmul.f32 2.0, %v1678_v6 }
 0x2a6   : > { %v1853_v29 = vadd.f32 %v2261_v58, %v1852_v28 }
 0x2a7   : > { %v2263_v14 = vpop.eup %2262  ;;  %v1694_v36 = vadd.f32 0.0009, %v1686_v31 }
 0x2a8   : > { %v1857_v3 = vsel %vm1856_vm12, %v2261_v58, %v1853_v29  ;;  %v1865_v32 = vmul.f32 %v2263_v14, %v1758_v13  ;;  %vm1870_vm14 = vweird.f32 %v2263_v14 }
 0x2a9   : > { %v1862_v20 = vsel %vm1859_vm13, %v1861_v22, %v1857_v3  ;;  %vm1871_vm1 = vmor %vm1869_vm15, %vm1870_vm14  ;;  %v1702_v4 = vmul.f32 %v1694_v36, %v1670_v37 }
 0x2aa   : > { %v1863_v26 = vmul.f32 %v1862_v20, %v1701_v30  ;;  %v1866_v35 = vsub.f32 1.0, %v1865_v32 }
 0x2ac   : > { %v1897_v24 = vsel %vm316_vm0, %v1863_v26, 0.0  ;;  %v1867_v18 = vmul.f32 %v2263_v14, %v1866_v35 }
 0x2ad   : > { %1898 = vadd.xlane.f32.xlu2 %v1897_v24 }
 0x2ae   : > { %v1868_v38 = vadd.f32 %v2263_v14, %v1867_v18 }
 0x2b0   : > { %v1872_v42 = vsel %vm1871_vm1, %v2263_v14, %v1868_v38 }
 0x2b1   : > { %v1877_v39 = vsel %vm1874_vm2, %v1876_v40, %v1872_v42 }
 0x2b2   : > { %v1878_v25 = vmul.f32 %v1877_v39, %v1702_v4 }
 0x2b4   : > { %v1900_v43 = vsel %vm316_vm0, %v1878_v25, 0.0  ;;  %vm1927_vm0 = vcmask 1041409  }
 0x2b5   : > { %1901 = vadd.xlane.f32.xlu1 %v1900_v43 }
 0x2f0   : > { %v1881_v45 = vpop.xlane.xlu2 %1880 }
 0x2f1   : > { %v1913_v55 = vperm.slane %v1881_v45, %v1912_v47 }
 0x2f8   : > { %v1884_v34 = vpop.xlane.xlu0 %1883 }
 0x2f9   : > { %v1915_v17 = vperm.slane %v1884_v34, %v1914_v41 }
 0x2fb   : > { %v1917_v57 = vsel %vm1916_vm3, %v1915_v17, %v1913_v55 }
 0x300   : > { %v1887_v44 = vpop.xlane.xlu1 %1886 }
 0x301   : > { %v1918_v51 = vperm.slane %v1887_v44, %v1912_v47 }
 0x308   : > { %v1890_v56 = vpop.xlane.xlu1 %1889 }
 0x309   : > { %v1919_v49 = vperm.slane %v1890_v56, %v1914_v41 }
 0x30b   : > { %v1920_v15 = vsel %vm1916_vm3, %v1919_v49, %v1918_v51 }
 0x30c   : > { %v1928_v13 = vsel %vm1927_vm0, %v1920_v15, %v1917_v57 }
 0x310   : > { %v1893_v46 = vpop.xlane.xlu2 %1892 }
 0x311   : > { %v1921_v54 = vperm.slane %v1893_v46, %v1912_v47 }
 0x318   : > { %v1896_v48 = vpop.xlane.xlu1 %1895 }
 0x319   : > { %v1922_v50 = vperm.slane %v1896_v48, %v1914_v41 }
 0x31b   : > { %v1923_v33 = vsel %vm1916_vm3, %v1922_v50, %v1921_v54 }
 0x31c   : > { %v1930_v21 = vsel %vm1929_vm4, %v1923_v33, %v1928_v13 }
 0x320   : > { %v1899_v7 = vpop.xlane.xlu2 %1898 }
 0x321   : > { %v1924_v19 = vperm.slane %v1899_v7, %v1912_v47 }
 0x328   : > { %v1902_v23 = vpop.xlane.xlu1 %1901 }
 0x329   : > { %v1925_v58 = vperm.slane %v1902_v23, %v1914_v41 }
 0x32b   : > { %v1926_v60 = vsel %vm1916_vm3, %v1925_v58, %v1924_v19 }
 0x32c   : > { %v1932_v61 = vsel %vm1931_vm5, %v1926_v60, %v1930_v21 }
 0x32d   : > { %v1935_v0 = vsel %vm1934_vm6, %v1932_v61, 0.0 }
 0x32e   : > { %1936 = vadd.xlane.f32.xlu0 %v1935_v0 }
 0x3a1   : > { %v1937_v2 = vpop.xlane.xlu0 %1936 }
 0x3a2   : > { %v1938_v5 = vmul.f32 0.00390625, %v1937_v2 }
 0x3a4   : > { %v1940_v8 = vperm.slane %v1938_v5, %v1912_v47 }
 0x3a6   : > { %1943 = vst.msk [vmem:[%s293_s24] sm:$0x1] %vm1942_vm7, %v1940_v8 }
 0x3a7   : > { %2411 = shalt.err (!%p2408_p11)
}
 0x3a8   : > { %2185 = dma.vmem_to_hbm [thread:$0]  (%p2565_p3), %s1956_s12, 16, %s1958_s27, %s1945_s28  }
 0x3a9 PF: > { %s1969_s23 = sand.u32 1, %s2450_s15   ;;  %p2955_p12 = scmp.ge.s32.totalorder %s2462_s18, 2 }
 0x3aa   : > { %s1970_s3 = scalar_lea.sflag [#allocation4], %s1969_s23 }
 0x3ab   : > { %p2202_p13 = pnand %p2955_p12, %p2528_p6 }
 0x3ad   : > { %p2203_p0 = pneg %p2202_p13 }
 0x3af   : > { %2445 = dma.done.wait (%p2203_p0), %s1970_s3, 16  }
 0x3b0   : > { %2447 = vsyncadd (%p2203_p0), %s1970_s3, 4294967280  ;;  %p21_p5 = scmp.ge.s32.totalorder %s2555_s10, 4   ;;  %s2956_s15 = smov %s2454_s16 }
 0x3b1   : > { %s2957_s16 = smov %s2458_s17  ;;  %s2958_s17 = smov %s2571_s14 }
 0x3b2   : > { %s2959_s18 = smov %s2555_s10  ;;  %23 = sbr.rel (!%p21_p5) target bundleno = 12 (0xc), region = 102 }
 0x3b7   :  { %1975 = vsyncpa [#allocation3], 1 }
 0x3b8   :  { %1977 = vsyncpa [#allocation3 + $0x1], 1 }
 0x3b9   :  { %1978 = vsyncpa [#allocation6], 1 }
 0x3ba   :  { %1980 = vsyncpa [#allocation6 + $0x1], 1 }
 0x3bb   :  { %1981 = vsyncpa [#allocation9], 1 }
 0x3bc   :  { %1982 = vsyncpa [#allocation4], 1 }
 0x3bd   :  { %1984 = vsyncpa [#allocation4 + $0x1], 1 }

</bundles_post_ra>
